<compile_context>
chip_gen: v7x
topology: tpu7x:2x2x1
jax: 0.10.0
libtpu: 0.0.40
codegen_flags: <defaults>
</compile_context>

<pallas_src>
import numpy as np
import jax
import jax.numpy as jnp
from jax.experimental import pallas as pl
from jax.experimental.pallas import tpu as pltpu


def _round_up(x, m):
    return ((x + m - 1) // m) * m


def _spec_buffered(block_shape, index_map, depth):
    """BlockSpec with deeper multi-buffering when this JAX supports it."""
    try:
        return pl.BlockSpec(block_shape, index_map, pipeline_mode=pl.Buffered(depth))
    except (TypeError, AttributeError):
        return pl.BlockSpec(block_shape, index_map)


# --------------------------------------------------------------------------
# Fused Conv 3x3 ('same', stride 1) + bias + ReLU [+ MaxPool 2x2], H-tiled
# --------------------------------------------------------------------------
def make_conv3x3_relu_pool_kernel(w, b, H, W, th, pool):
    """Kernel: x_ref (Cin,H,W) resident; writes a th-row (pooled: th/2) output tile.

    MACs on the VPU (f32), halo/pool shifts on the XLU, even-column pool
    selection as one batched MXU matmul against a resident constant matrix.
    """
    w = np.asarray(w, dtype=np.float32)
    b = np.asarray(b, dtype=np.float32)
    Cout, Cin = int(w.shape[0]), int(w.shape[1])
    Wo = W // 2
    tho = th // 2 if pool else th

    def compute_acc(x_ref):
        row0 = pl.program_id(1) * th
        if th % 8 == 0:
            row0 = pl.multiple_of(row0, 8)

        # Column-validity masks for the 'same' halo, built as (1, W) vectors.
        col_idx = jax.lax.broadcasted_iota(jnp.int32, (1, W), 1)
        col_ok = {1: col_idx < (W - 1), -1: col_idx > 0}
        # Row-position masks within the tile, built as (th, 1) vectors.
        row_idx = jax.lax.broadcasted_iota(jnp.int32, (th, 1), 0)
        first_row = row_idx == 0
        last_row = row_idx == (th - 1)

        # Cout accumulators for this row tile, initialized with the bias.
        acc = [jnp.full((th, W), float(b[co]), dtype=jnp.float32)
               for co in range(Cout)]

        for ci in range(Cin):
            xs0 = x_ref[ci, pl.ds(row0, th), :]                    # rows row0..row0+th-1
            # Row-shifted planes built ONCE per ci (hoisted out of the ox loop);
            # halo rows come from clamped 1-row reads of the resident plane.
            up = x_ref[ci, pl.ds(jnp.maximum(row0 - 1, 0), 1), :]
            up = jnp.where(row0 > 0, up, 0.0)
            dn = x_ref[ci, pl.ds(jnp.minimum(row0 + th, H - 1), 1), :]
            dn = jnp.where(row0 + th < H, dn, 0.0)
            xs_m = jnp.where(first_row, up, pltpu.roll(xs0, shift=1, axis=0))
            xs_p = jnp.where(last_row, dn, pltpu.roll(xs0, shift=th - 1, axis=0))
            rows = {-1: xs_m, 0: xs0, 1: xs_p}

            for oy in (-1, 0, 1):
                xr = rows[oy]
                for ox in (-1, 0, 1):
                    xs = xr
                    if ox != 0:
                        xs = pltpu.roll(xs, shift=(-ox) % W, axis=1)
                        xs = jnp.where(col_ok[ox], xs, 0.0)
                    for co in range(Cout):
                        acc[co] = acc[co] + float(w[co, ci, oy + 1, ox + 1]) * xs
        return acc

    if not pool:
        def kernel(x_ref, o_ref):
            acc = compute_acc(x_ref)
            for co in range(Cout):
                o_ref[co] = jnp.maximum(acc[co], 0.0).astype(o_ref.dtype)
        return kernel

    def kernel(x_ref, sel_ref, o_ref, scratch_ref):
        acc = compute_acc(x_ref)
        # ReLU + 2x2 window max via rolls (wrapped rows/cols are odd -> never kept).
        for co in range(Cout):
            a = jnp.maximum(acc[co], 0.0)
            a = jnp.maximum(a, pltpu.roll(a, shift=th - 1, axis=0))   # max(y, y+1)
            a = jnp.maximum(a, pltpu.roll(a, shift=W - 1, axis=1))    # max(x, x+1)
            scratch_ref[co * th:(co + 1) * th, :] = a
        # Even rows of every channel with ONE stride-2 sublane read ...
        sel = scratch_ref[pl.ds(0, Cout * tho, stride=2), :]          # (Cout*tho, W)
        # ... and even columns of all channels with ONE batched matmul.
        pooled = jnp.dot(sel, sel_ref[...], preferred_element_type=jnp.float32)
        o_ref[...] = pooled.reshape(Cout, tho, Wo).astype(o_ref.dtype)

    return kernel


def conv3x3_relu_pool(x, w, b, *, pool, out_dtype=jnp.float32):
    """x: (N, Cin, H, W) -> (N, Cout, H, W) or (N, Cout, H//2, W//2)."""
    N, Cin, H, W = x.shape
    Cout = int(np.asarray(w).shape[0])
    if pool:
        assert H % 2 == 0 and W % 2 == 0, "2x2 max-pool needs even H, W"
    th = 16 if (H % 16 == 0) else H           # row-tile; bounds live vregs
    assert H % th == 0
    if pool:
        assert th % 2 == 0
    n_h = H // th
    Ho, Wo = (H // 2, W // 2) if pool else (H, W)
    tho = th // 2 if pool else th

    kernel = make_conv3x3_relu_pool_kernel(w, b, H, W, th, pool)

    # Input plane stays resident across the H tiles (block index ignores h).
    in_specs = [pl.BlockSpec((None, Cin, H, W), lambda n, h: (n, 0, 0, 0))]
    operands = [x]
    scratch = []
    if pool:
        cols = np.arange(W)[:, None]
        outs = np.arange(Wo)[None, :]
        sel_cols = jnp.asarray((cols == 2 * outs).astype(np.float32))   # (W, Wo)
        in_specs.append(pl.BlockSpec((W, Wo), lambda n, h: (0, 0)))     # resident const
        operands.append(sel_cols)
        scratch = [pltpu.VMEM((Cout * th, W), jnp.float32)]

    return pl.pallas_call(
        kernel,
        out_shape=jax.ShapeDtypeStruct((N, Cout, Ho, Wo), out_dtype),
        grid_spec=pltpu.PrefetchScalarGridSpec(
            num_scalar_prefetch=0,
            grid=(N, n_h),
            in_specs=in_specs,
            out_specs=pl.BlockSpec((None, Cout, tho, Wo), lambda n, h: (n, 0, h, 0)),
            scratch_shapes=scratch,
        ),
        compiler_params=pltpu.CompilerParams(
            dimension_semantics=("parallel", "parallel"),
            vmem_limit_bytes=32 * 1024 * 1024,
        ),
    )(*operands)


# --------------------------------------------------------------------------
# Linear: y = x @ W^T + b  — K-tiled, bf16 weight streaming, f32 accumulate
# --------------------------------------------------------------------------
def _linear_kernel(x_ref, w_ref, b_ref, o_ref, acc_ref):
    @pl.when(pl.program_id(1) == 0)
    def _():
        acc_ref[...] = jnp.zeros_like(acc_ref)

    acc_ref[...] += jnp.dot(x_ref[...], w_ref[...],
                            preferred_element_type=jnp.float32)

    @pl.when(pl.program_id(1) == pl.num_programs(1) - 1)
    def _():
        o_ref[...] = acc_ref[...] + b_ref[...]


def prepare_linear_params(wt, b, *, tn=1024, tk_max=4096):
    """Pad to tile multiples and cast to bf16 ONCE at init (not per call)."""
    K, O = wt.shape
    tk = min(tk_max, _round_up(K, 128))
    K_pad = _round_up(K, tk)
    O_pad = _round_up(O, tn)
    wt_p = jnp.pad(jnp.asarray(wt), ((0, K_pad - K), (0, O_pad - O))).astype(jnp.bfloat16)
    b_p = jnp.pad(jnp.asarray(b), ((0, O_pad - O),)).reshape(1, O_pad).astype(jnp.float32)
    return dict(wt=wt_p, b=b_p, n_out=O, k_in=K, tk=tk, tn=tn)


def linear(x, lin):
    """x: (M, K) (already bf16 from the conv stack) -> (M, n_out) f32 logits."""
    wt_p, b_p = lin["wt"], lin["b"]
    tn, tk, O = lin["tn"], lin["tk"], lin["n_out"]
    M, K = x.shape
    K_pad, O_pad = wt_p.shape
    if x.dtype != jnp.bfloat16:
        x = x.astype(jnp.bfloat16)
    if K_pad != K:                      # not hit in the HappyWhaleNet shapes
        x = jnp.pad(x, ((0, 0), (0, K_pad - K)))

    out = pl.pallas_call(
        _linear_kernel,
        out_shape=jax.ShapeDtypeStruct((M, O_pad), jnp.float32),
        grid_spec=pltpu.PrefetchScalarGridSpec(
            num_scalar_prefetch=0,
            grid=(O_pad // tn, K_pad // tk),        # reduction axis last
            in_specs=[
                pl.BlockSpec((M, tk), lambda j, k: (0, k)),
                _spec_buffered((tk, tn), lambda j, k: (k, j), 3),  # weight stream
                pl.BlockSpec((1, tn), lambda j, k: (0, j)),
            ],
            out_specs=pl.BlockSpec((M, tn), lambda j, k: (0, j)),
            scratch_shapes=[pltpu.VMEM((M, tn), jnp.float32)],
        ),
        compiler_params=pltpu.CompilerParams(
            dimension_semantics=("parallel", "arbitrary"),
            vmem_limit_bytes=48 * 1024 * 1024,      # 8 MiB blocks x3 + slack; < v7x 64 MiB
        ),
    )(x, wt_p, b_p)
    return out[:, :O]


# --------------------------------------------------------------------------
# Parameter init (deterministic, PyTorch-default-style uniform ranges)
# --------------------------------------------------------------------------
def init_params(key, H, W, num_classes):
    ks = jax.random.split(key, 5)

    def conv_init(k, cout, cin):
        fan_in = cin * 9
        bound = 1.0 / np.sqrt(fan_in)
        kw, kb = jax.random.split(k)
        ww = jax.random.uniform(kw, (cout, cin, 3, 3), jnp.float32, -bound, bound)
        bb = jax.random.uniform(kb, (cout,), jnp.float32, -bound, bound)
        return np.asarray(ww), np.asarray(bb)

    conv1 = conv_init(ks[0], 3, 3)
    conv2 = conv_init(ks[1], 6, 3)
    conv3 = conv_init(ks[2], 6, 6)

    feat = 6 * (H // 4) * (W // 4)        # nn.Linear(in_features, num_classes)
    bound = 1.0 / np.sqrt(feat)
    wt = jax.random.uniform(ks[3], (feat, num_classes), jnp.float32, -bound, bound)
    bl = jax.random.uniform(ks[4], (num_classes,), jnp.float32, -bound, bound)
    return dict(conv1=conv1, conv2=conv2, conv3=conv3,
                linear=prepare_linear_params(wt, bl))


# --------------------------------------------------------------------------
# Forward pass == HappyWhaleNet.forward
# --------------------------------------------------------------------------
def happywhale_forward(x, params):
    y = conv3x3_relu_pool(x, *params["conv1"], pool=True)     # Conv(3,3)+ReLU+Pool
    y = conv3x3_relu_pool(y, *params["conv2"], pool=True)     # Conv(3,6)+ReLU+Pool
    y = conv3x3_relu_pool(y, *params["conv3"], pool=False,
                          out_dtype=jnp.bfloat16)             # Conv(6,6)+ReLU -> bf16
    feats = y.reshape(y.shape[0], -1)                         # Flatten (NCHW order)
    return linear(feats, params["linear"])                    # Linear -> logits


# --------------------------------------------------------------------------
# Pure-JAX reference (same math; linear uses the same bf16 weight stream)
# --------------------------------------------------------------------------
def reference_forward(x, params):
    def conv(z, w, b):
        y = jax.lax.conv_general_dilated(
            z, jnp.asarray(w), window_strides=(1, 1), padding="SAME",
            dimension_numbers=("NCHW", "OIHW", "NCHW"))
        return jax.nn.relu(y + jnp.asarray(b)[None, :, None, None])

    def pool(z):
        return jax.lax.reduce_window(
            z, jnp.array(-jnp.inf, dtype=z.dtype), jax.lax.max,
            (1, 1, 2, 2), (1, 1, 2, 2), "VALID")

    y = pool(conv(x, *params["conv1"]))
    y = pool(conv(y, *params["conv2"]))
    y = conv(y, *params["conv3"])
    feats = y.reshape(y.shape[0], -1).astype(jnp.bfloat16)
    lin = params["linear"]
    K, O = lin["k_in"], lin["n_out"]
    wt_b = lin["wt"][:K, :O]                    # same bf16 weight the kernel streams
    logits = jnp.dot(feats, wt_b, preferred_element_type=jnp.float32)
    return logits + lin["b"][0, :O]


if __name__ == "__main__":
    # Small stand-in shapes: the real module implies 256x256 images
    # (64*64*6 linear fan-in); here we use 32x32 -> fan-in 8*8*6 = 384.
    H = W = 32
    NUM_CLASSES = 15587  # same class count as the module
    key = jax.random.PRNGKey(0)
    kx, kp = jax.random.split(key)
    x = jax.random.normal(kx, (2, 3, H, W), jnp.float32)
    params = init_params(kp, H, W, NUM_CLASSES)

    logits = happywhale_forward(x, params)
    jax.block_until_ready(logits)
    assert logits.shape == (2, NUM_CLASSES), logits.shape
    assert bool(jnp.all(jnp.isfinite(logits)))

    ref = reference_forward(x, params)
    jax.block_until_ready(ref)
    assert bool(jnp.allclose(logits, ref, rtol=2e-2, atol=2e-2)), (
        float(jnp.max(jnp.abs(logits - ref))))

    print("KERNEL_OK")
</pallas_src>

<mosaic_0001>
module attributes {stable_mosaic.version = 11 : i64} {
  func.func @kernel(%arg0: i32, %arg1: i32, %arg2: memref<1x3x32x32xf32, #tpu.memory_space<vmem>>, %arg3: memref<32x16xf32, #tpu.memory_space<vmem>>, %arg4: memref<1x3x8x16xf32, #tpu.memory_space<vmem>>, %arg5: memref<48x32xf32, #tpu.memory_space<vmem>>) attributes {dimension_semantics = [#tpu.dimension_semantics<parallel>, #tpu.dimension_semantics<parallel>], iteration_bounds = array<i64: 2, 2>, scalar_prefetch = 0 : i64, scratch_operands = 1 : i64, tpu.core_type = #tpu.core_type<tc>, window_params = [{transform_indices = @transform_0, window_bounds = array<i64: 1, 3, 32, 32>}, {pipeline_mode = #tpu.pipeline_mode<synchronous>, transform_indices = @transform_1, window_bounds = array<i64: 32, 16>}, {transform_indices = @transform_2, window_bounds = array<i64: 1, 3, 8, 16>}]} {
    %c16_i32 = arith.constant 16 : i32
    %0 = arith.muli %arg1, %c16_i32 : i32
    %1 = tpu.assume_multiple %0, 8 : i32
    %2 = tpu.iota {dimensions = array<i32: 1>} : vector<1x32xi32>
    %c31_i32 = arith.constant 31 : i32
    %3 = vector.broadcast %c31_i32 : i32 to vector<1x32xi32>
    %4 = arith.cmpi slt, %2, %3 : vector<1x32xi32>
    %c0_i32 = arith.constant 0 : i32
    %5 = vector.broadcast %c0_i32 : i32 to vector<1x32xi32>
    %6 = arith.cmpi sgt, %2, %5 : vector<1x32xi32>
    %7 = tpu.iota {dimensions = array<i32: 0>} : vector<16x1xi32>
    %c0_i32_0 = arith.constant 0 : i32
    %8 = vector.broadcast %c0_i32_0 : i32 to vector<16x1xi32>
    %9 = arith.cmpi eq, %7, %8 : vector<16x1xi32>
    %c15_i32 = arith.constant 15 : i32
    %10 = vector.broadcast %c15_i32 : i32 to vector<16x1xi32>
    %11 = arith.cmpi eq, %7, %10 : vector<16x1xi32>
    %cst = arith.constant 0.0813465714 : f32
    %12 = vector.broadcast %cst : f32 to vector<16x32xf32>
    %cst_1 = arith.constant 9.642960e-03 : f32
    %13 = vector.broadcast %cst_1 : f32 to vector<16x32xf32>
    %cst_2 = arith.constant 0.18844679 : f32
    %14 = vector.broadcast %cst_2 : f32 to vector<16x32xf32>
    %c0 = arith.constant 0 : index
    %c0_3 = arith.constant 0 : index
    %15 = arith.index_cast %1 : i32 to index
    %c0_4 = arith.constant 0 : index
    %16 = vector.load %arg2[%c0, %c0_3, %15, %c0_4] : memref<1x3x32x32xf32, #tpu.memory_space<vmem>>, vector<1x1x16x32xf32>
    %17 = vector.shape_cast %16 : vector<1x1x16x32xf32> to vector<16x32xf32>
    %c1_i32 = arith.constant 1 : i32
    %18 = arith.subi %1, %c1_i32 : i32
    %c0_i32_5 = arith.constant 0 : i32
    %19 = arith.maxsi %18, %c0_i32_5 : i32
    %c0_6 = arith.constant 0 : index
    %c0_7 = arith.constant 0 : index
    %20 = arith.index_cast %19 : i32 to index
    %c0_8 = arith.constant 0 : index
    %21 = vector.load %arg2[%c0_6, %c0_7, %20, %c0_8] : memref<1x3x32x32xf32, #tpu.memory_space<vmem>>, vector<1x1x1x32xf32>
    %22 = vector.shape_cast %21 : vector<1x1x1x32xf32> to vector<1x32xf32>
    %c0_i32_9 = arith.constant 0 : i32
    %23 = arith.cmpi sgt, %1, %c0_i32_9 : i32
    %cst_10 = arith.constant 0.000000e+00 : f32
    %24 = vector.broadcast %cst_10 : f32 to vector<1x32xf32>
    %25 = arith.select %23, %22, %24 : vector<1x32xf32>
    %c16_i32_11 = arith.constant 16 : i32
    %26 = arith.addi %1, %c16_i32_11 : i32
    %c31_i32_12 = arith.constant 31 : i32
    %27 = arith.minsi %26, %c31_i32_12 : i32
    %c0_13 = arith.constant 0 : index
    %c0_14 = arith.constant 0 : index
    %28 = arith.index_cast %27 : i32 to index
    %c0_15 = arith.constant 0 : index
    %29 = vector.load %arg2[%c0_13, %c0_14, %28, %c0_15] : memref<1x3x32x32xf32, #tpu.memory_space<vmem>>, vector<1x1x1x32xf32>
    %30 = vector.shape_cast %29 : vector<1x1x1x32xf32> to vector<1x32xf32>
    %c16_i32_16 = arith.constant 16 : i32
    %31 = arith.addi %1, %c16_i32_16 : i32
    %c32_i32 = arith.constant 32 : i32
    %32 = arith.cmpi slt, %31, %c32_i32 : i32
    %cst_17 = arith.constant 0.000000e+00 : f32
    %33 = vector.broadcast %cst_17 : f32 to vector<1x32xf32>
    %34 = arith.select %32, %30, %33 : vector<1x32xf32>
    %c1_i32_18 = arith.constant 1 : i32
    %35 = tpu.dynamic_rotate %17 by %c1_i32_18 dim 0 : vector<16x32xf32>, i32 -> vector<16x32xf32>
    %36 = vector.shape_cast %9 : vector<16x1xi1> to vector<16x1xi1>
    %37 = vector.broadcast %36 : vector<16x1xi1> to vector<16x32xi1>
    %38 = vector.shape_cast %25 : vector<1x32xf32> to vector<1x32xf32>
    %39 = vector.broadcast %38 : vector<1x32xf32> to vector<16x32xf32>
    %40 = arith.select %37, %39, %35 : vector<16x32xi1>, vector<16x32xf32>
    %c15_i32_19 = arith.constant 15 : i32
    %41 = tpu.dynamic_rotate %17 by %c15_i32_19 dim 0 : vector<16x32xf32>, i32 -> vector<16x32xf32>
    %42 = vector.shape_cast %11 : vector<16x1xi1> to vector<16x1xi1>
    %43 = vector.broadcast %42 : vector<16x1xi1> to vector<16x32xi1>
    %44 = vector.shape_cast %34 : vector<1x32xf32> to vector<1x32xf32>
    %45 = vector.broadcast %44 : vector<1x32xf32> to vector<16x32xf32>
    %46 = arith.select %43, %45, %41 : vector<16x32xi1>, vector<16x32xf32>
    %c1_i32_20 = arith.constant 1 : i32
    %47 = tpu.dynamic_rotate %40 by %c1_i32_20 dim 1 : vector<16x32xf32>, i32 -> vector<16x32xf32>
    %cst_21 = arith.constant 0.000000e+00 : f32
    %48 = vector.shape_cast %6 : vector<1x32xi1> to vector<1x32xi1>
    %49 = vector.broadcast %48 : vector<1x32xi1> to vector<16x32xi1>
    %50 = vector.broadcast %cst_21 : f32 to vector<16x32xf32>
    %51 = arith.select %49, %47, %50 : vector<16x32xi1>, vector<16x32xf32>
    %cst_22 = arith.constant 0.0481751077 : f32
    %52 = vector.broadcast %cst_22 : f32 to vector<16x32xf32>
    %53 = arith.mulf %52, %51 : vector<16x32xf32>
    %54 = arith.addf %12, %53 : vector<16x32xf32>
    %cst_23 = arith.constant 0.0179258808 : f32
    %55 = vector.broadcast %cst_23 : f32 to vector<16x32xf32>
    %56 = arith.mulf %55, %51 : vector<16x32xf32>
    %57 = arith.addf %13, %56 : vector<16x32xf32>
    %cst_24 = arith.constant -0.0237159431 : f32
    %58 = vector.broadcast %cst_24 : f32 to vector<16x32xf32>
    %59 = arith.mulf %58, %51 : vector<16x32xf32>
    %60 = arith.addf %14, %59 : vector<16x32xf32>
    %cst_25 = arith.constant -0.0456290245 : f32
    %61 = vector.broadcast %cst_25 : f32 to vector<16x32xf32>
    %62 = arith.mulf %61, %40 : vector<16x32xf32>
    %63 = arith.addf %54, %62 : vector<16x32xf32>
    %cst_26 = arith.constant -0.111774705 : f32
    %64 = vector.broadcast %cst_26 : f32 to vector<16x32xf32>
    %65 = arith.mulf %64, %40 : vector<16x32xf32>
    %66 = arith.addf %57, %65 : vector<16x32xf32>
    %cst_27 = arith.constant 0.077223517 : f32
    %67 = vector.broadcast %cst_27 : f32 to vector<16x32xf32>
    %68 = arith.mulf %67, %40 : vector<16x32xf32>
    %69 = arith.addf %60, %68 : vector<16x32xf32>
    %c31_i32_28 = arith.constant 31 : i32
    %70 = tpu.dynamic_rotate %40 by %c31_i32_28 dim 1 : vector<16x32xf32>, i32 -> vector<16x32xf32>
    %cst_29 = arith.constant 0.000000e+00 : f32
    %71 = vector.shape_cast %4 : vector<1x32xi1> to vector<1x32xi1>
    %72 = vector.broadcast %71 : vector<1x32xi1> to vector<16x32xi1>
    %73 = vector.broadcast %cst_29 : f32 to vector<16x32xf32>
    %74 = arith.select %72, %70, %73 : vector<16x32xi1>, vector<16x32xf32>
    %cst_30 = arith.constant -0.122920126 : f32
    %75 = vector.broadcast %cst_30 : f32 to vector<16x32xf32>
    %76 = arith.mulf %75, %74 : vector<16x32xf32>
    %77 = arith.addf %63, %76 : vector<16x32xf32>
    %cst_31 = arith.constant 0.133900046 : f32
    %78 = vector.broadcast %cst_31 : f32 to vector<16x32xf32>
    %79 = arith.mulf %78, %74 : vector<16x32xf32>
    %80 = arith.addf %66, %79 : vector<16x32xf32>
    %cst_32 = arith.constant 0.183649182 : f32
    %81 = vector.broadcast %cst_32 : f32 to vector<16x32xf32>
    %82 = arith.mulf %81, %74 : vector<16x32xf32>
    %83 = arith.addf %69, %82 : vector<16x32xf32>
    %c1_i32_33 = arith.constant 1 : i32
    %84 = tpu.dynamic_rotate %17 by %c1_i32_33 dim 1 : vector<16x32xf32>, i32 -> vector<16x32xf32>
    %cst_34 = arith.constant 0.000000e+00 : f32
    %85 = vector.shape_cast %6 : vector<1x32xi1> to vector<1x32xi1>
    %86 = vector.broadcast %85 : vector<1x32xi1> to vector<16x32xi1>
    %87 = vector.broadcast %cst_34 : f32 to vector<16x32xf32>
    %88 = arith.select %86, %84, %87 : vector<16x32xi1>, vector<16x32xf32>
    %cst_35 = arith.constant -0.132459342 : f32
    %89 = vector.broadcast %cst_35 : f32 to vector<16x32xf32>
    %90 = arith.mulf %89, %88 : vector<16x32xf32>
    %91 = arith.addf %77, %90 : vector<16x32xf32>
    %cst_36 = arith.constant -0.0252749324 : f32
    %92 = vector.broadcast %cst_36 : f32 to vector<16x32xf32>
    %93 = arith.mulf %92, %88 : vector<16x32xf32>
    %94 = arith.addf %80, %93 : vector<16x32xf32>
    %cst_37 = arith.constant 0.095227167 : f32
    %95 = vector.broadcast %cst_37 : f32 to vector<16x32xf32>
    %96 = arith.mulf %95, %88 : vector<16x32xf32>
    %97 = arith.addf %83, %96 : vector<16x32xf32>
    %cst_38 = arith.constant -0.106628753 : f32
    %98 = vector.broadcast %cst_38 : f32 to vector<16x32xf32>
    %99 = arith.mulf %98, %17 : vector<16x32xf32>
    %100 = arith.addf %91, %99 : vector<16x32xf32>
    %cst_39 = arith.constant 0.0382513851 : f32
    %101 = vector.broadcast %cst_39 : f32 to vector<16x32xf32>
    %102 = arith.mulf %101, %17 : vector<16x32xf32>
    %103 = arith.addf %94, %102 : vector<16x32xf32>
    %cst_40 = arith.constant 0.0747406557 : f32
    %104 = vector.broadcast %cst_40 : f32 to vector<16x32xf32>
    %105 = arith.mulf %104, %17 : vector<16x32xf32>
    %106 = arith.addf %97, %105 : vector<16x32xf32>
    %c31_i32_41 = arith.constant 31 : i32
    %107 = tpu.dynamic_rotate %17 by %c31_i32_41 dim 1 : vector<16x32xf32>, i32 -> vector<16x32xf32>
    %cst_42 = arith.constant 0.000000e+00 : f32
    %108 = vector.shape_cast %4 : vector<1x32xi1> to vector<1x32xi1>
    %109 = vector.broadcast %108 : vector<1x32xi1> to vector<16x32xi1>
    %110 = vector.broadcast %cst_42 : f32 to vector<16x32xf32>
    %111 = arith.select %109, %107, %110 : vector<16x32xi1>, vector<16x32xf32>
    %cst_43 = arith.constant -0.0502599701 : f32
    %112 = vector.broadcast %cst_43 : f32 to vector<16x32xf32>
    %113 = arith.mulf %112, %111 : vector<16x32xf32>
    %114 = arith.addf %100, %113 : vector<16x32xf32>
    %cst_44 = arith.constant -0.0686034411 : f32
    %115 = vector.broadcast %cst_44 : f32 to vector<16x32xf32>
    %116 = arith.mulf %115, %111 : vector<16x32xf32>
    %117 = arith.addf %103, %116 : vector<16x32xf32>
    %cst_45 = arith.constant 0.133301809 : f32
    %118 = vector.broadcast %cst_45 : f32 to vector<16x32xf32>
    %119 = arith.mulf %118, %111 : vector<16x32xf32>
    %120 = arith.addf %106, %119 : vector<16x32xf32>
    %c1_i32_46 = arith.constant 1 : i32
    %121 = tpu.dynamic_rotate %46 by %c1_i32_46 dim 1 : vector<16x32xf32>, i32 -> vector<16x32xf32>
    %cst_47 = arith.constant 0.000000e+00 : f32
    %122 = vector.shape_cast %6 : vector<1x32xi1> to vector<1x32xi1>
    %123 = vector.broadcast %122 : vector<1x32xi1> to vector<16x32xi1>
    %124 = vector.broadcast %cst_47 : f32 to vector<16x32xf32>
    %125 = arith.select %123, %121, %124 : vector<16x32xi1>, vector<16x32xf32>
    %cst_48 = arith.constant 0.0580609776 : f32
    %126 = vector.broadcast %cst_48 : f32 to vector<16x32xf32>
    %127 = arith.mulf %126, %125 : vector<16x32xf32>
    %128 = arith.addf %114, %127 : vector<16x32xf32>
    %cst_49 = arith.constant 0.0939898192 : f32
    %129 = vector.broadcast %cst_49 : f32 to vector<16x32xf32>
    %130 = arith.mulf %129, %125 : vector<16x32xf32>
    %131 = arith.addf %117, %130 : vector<16x32xf32>
    %cst_50 = arith.constant 0.160869956 : f32
    %132 = vector.broadcast %cst_50 : f32 to vector<16x32xf32>
    %133 = arith.mulf %132, %125 : vector<16x32xf32>
    %134 = arith.addf %120, %133 : vector<16x32xf32>
    %cst_51 = arith.constant -0.00776645495 : f32
    %135 = vector.broadcast %cst_51 : f32 to vector<16x32xf32>
    %136 = arith.mulf %135, %46 : vector<16x32xf32>
    %137 = arith.addf %128, %136 : vector<16x32xf32>
    %cst_52 = arith.constant 0.0572874211 : f32
    %138 = vector.broadcast %cst_52 : f32 to vector<16x32xf32>
    %139 = arith.mulf %138, %46 : vector<16x32xf32>
    %140 = arith.addf %131, %139 : vector<16x32xf32>
    %cst_53 = arith.constant 0.0742514431 : f32
    %141 = vector.broadcast %cst_53 : f32 to vector<16x32xf32>
    %142 = arith.mulf %141, %46 : vector<16x32xf32>
    %143 = arith.addf %134, %142 : vector<16x32xf32>
    %c31_i32_54 = arith.constant 31 : i32
    %144 = tpu.dynamic_rotate %46 by %c31_i32_54 dim 1 : vector<16x32xf32>, i32 -> vector<16x32xf32>
    %cst_55 = arith.constant 0.000000e+00 : f32
    %145 = vector.shape_cast %4 : vector<1x32xi1> to vector<1x32xi1>
    %146 = vector.broadcast %145 : vector<1x32xi1> to vector<16x32xi1>
    %147 = vector.broadcast %cst_55 : f32 to vector<16x32xf32>
    %148 = arith.select %146, %144, %147 : vector<16x32xi1>, vector<16x32xf32>
    %cst_56 = arith.constant -0.0127794761 : f32
    %149 = vector.broadcast %cst_56 : f32 to vector<16x32xf32>
    %150 = arith.mulf %149, %148 : vector<16x32xf32>
    %151 = arith.addf %137, %150 : vector<16x32xf32>
    %cst_57 = arith.constant 0.0196802896 : f32
    %152 = vector.broadcast %cst_57 : f32 to vector<16x32xf32>
    %153 = arith.mulf %152, %148 : vector<16x32xf32>
    %154 = arith.addf %140, %153 : vector<16x32xf32>
    %cst_58 = arith.constant -0.0937921554 : f32
    %155 = vector.broadcast %cst_58 : f32 to vector<16x32xf32>
    %156 = arith.mulf %155, %148 : vector<16x32xf32>
    %157 = arith.addf %143, %156 : vector<16x32xf32>
    %c0_59 = arith.constant 0 : index
    %c1 = arith.constant 1 : index
    %158 = arith.index_cast %1 : i32 to index
    %c0_60 = arith.constant 0 : index
    %159 = vector.load %arg2[%c0_59, %c1, %158, %c0_60] : memref<1x3x32x32xf32, #tpu.memory_space<vmem>>, vector<1x1x16x32xf32>
    %160 = vector.shape_cast %159 : vector<1x1x16x32xf32> to vector<16x32xf32>
    %c1_i32_61 = arith.constant 1 : i32
    %161 = arith.subi %1, %c1_i32_61 : i32
    %c0_i32_62 = arith.constant 0 : i32
    %162 = arith.maxsi %161, %c0_i32_62 : i32
    %c0_63 = arith.constant 0 : index
    %c1_64 = arith.constant 1 : index
    %163 = arith.index_cast %162 : i32 to index
    %c0_65 = arith.constant 0 : index
    %164 = vector.load %arg2[%c0_63, %c1_64, %163, %c0_65] : memref<1x3x32x32xf32, #tpu.memory_space<vmem>>, vector<1x1x1x32xf32>
    %165 = vector.shape_cast %164 : vector<1x1x1x32xf32> to vector<1x32xf32>
    %c0_i32_66 = arith.constant 0 : i32
    %166 = arith.cmpi sgt, %1, %c0_i32_66 : i32
    %cst_67 = arith.constant 0.000000e+00 : f32
    %167 = vector.broadcast %cst_67 : f32 to vector<1x32xf32>
    %168 = arith.select %166, %165, %167 : vector<1x32xf32>
    %c16_i32_68 = arith.constant 16 : i32
    %169 = arith.addi %1, %c16_i32_68 : i32
    %c31_i32_69 = arith.constant 31 : i32
    %170 = arith.minsi %169, %c31_i32_69 : i32
    %c0_70 = arith.constant 0 : index
    %c1_71 = arith.constant 1 : index
    %171 = arith.index_cast %170 : i32 to index
    %c0_72 = arith.constant 0 : index
    %172 = vector.load %arg2[%c0_70, %c1_71, %171, %c0_72] : memref<1x3x32x32xf32, #tpu.memory_space<vmem>>, vector<1x1x1x32xf32>
    %173 = vector.shape_cast %172 : vector<1x1x1x32xf32> to vector<1x32xf32>
    %c16_i32_73 = arith.constant 16 : i32
    %174 = arith.addi %1, %c16_i32_73 : i32
    %c32_i32_74 = arith.constant 32 : i32
    %175 = arith.cmpi slt, %174, %c32_i32_74 : i32
    %cst_75 = arith.constant 0.000000e+00 : f32
    %176 = vector.broadcast %cst_75 : f32 to vector<1x32xf32>
    %177 = arith.select %175, %173, %176 : vector<1x32xf32>
    %c1_i32_76 = arith.constant 1 : i32
    %178 = tpu.dynamic_rotate %160 by %c1_i32_76 dim 0 : vector<16x32xf32>, i32 -> vector<16x32xf32>
    %179 = vector.shape_cast %9 : vector<16x1xi1> to vector<16x1xi1>
    %180 = vector.broadcast %179 : vector<16x1xi1> to vector<16x32xi1>
    %181 = vector.shape_cast %168 : vector<1x32xf32> to vector<1x32xf32>
    %182 = vector.broadcast %181 : vector<1x32xf32> to vector<16x32xf32>
    %183 = arith.select %180, %182, %178 : vector<16x32xi1>, vector<16x32xf32>
    %c15_i32_77 = arith.constant 15 : i32
    %184 = tpu.dynamic_rotate %160 by %c15_i32_77 dim 0 : vector<16x32xf32>, i32 -> vector<16x32xf32>
    %185 = vector.shape_cast %11 : vector<16x1xi1> to vector<16x1xi1>
    %186 = vector.broadcast %185 : vector<16x1xi1> to vector<16x32xi1>
    %187 = vector.shape_cast %177 : vector<1x32xf32> to vector<1x32xf32>
    %188 = vector.broadcast %187 : vector<1x32xf32> to vector<16x32xf32>
    %189 = arith.select %186, %188, %184 : vector<16x32xi1>, vector<16x32xf32>
    %c1_i32_78 = arith.constant 1 : i32
    %190 = tpu.dynamic_rotate %183 by %c1_i32_78 dim 1 : vector<16x32xf32>, i32 -> vector<16x32xf32>
    %cst_79 = arith.constant 0.000000e+00 : f32
    %191 = vector.shape_cast %6 : vector<1x32xi1> to vector<1x32xi1>
    %192 = vector.broadcast %191 : vector<1x32xi1> to vector<16x32xi1>
    %193 = vector.broadcast %cst_79 : f32 to vector<16x32xf32>
    %194 = arith.select %192, %190, %193 : vector<16x32xi1>, vector<16x32xf32>
    %cst_80 = arith.constant 0.0328479409 : f32
    %195 = vector.broadcast %cst_80 : f32 to vector<16x32xf32>
    %196 = arith.mulf %195, %194 : vector<16x32xf32>
    %197 = arith.addf %151, %196 : vector<16x32xf32>
    %cst_81 = arith.constant -0.109196544 : f32
    %198 = vector.broadcast %cst_81 : f32 to vector<16x32xf32>
    %199 = arith.mulf %198, %194 : vector<16x32xf32>
    %200 = arith.addf %154, %199 : vector<16x32xf32>
    %cst_82 = arith.constant -0.0343327373 : f32
    %201 = vector.broadcast %cst_82 : f32 to vector<16x32xf32>
    %202 = arith.mulf %201, %194 : vector<16x32xf32>
    %203 = arith.addf %157, %202 : vector<16x32xf32>
    %cst_83 = arith.constant 0.032728184 : f32
    %204 = vector.broadcast %cst_83 : f32 to vector<16x32xf32>
    %205 = arith.mulf %204, %183 : vector<16x32xf32>
    %206 = arith.addf %197, %205 : vector<16x32xf32>
    %cst_84 = arith.constant 0.107677519 : f32
    %207 = vector.broadcast %cst_84 : f32 to vector<16x32xf32>
    %208 = arith.mulf %207, %183 : vector<16x32xf32>
    %209 = arith.addf %200, %208 : vector<16x32xf32>
    %cst_85 = arith.constant 0.0891632289 : f32
    %210 = vector.broadcast %cst_85 : f32 to vector<16x32xf32>
    %211 = arith.mulf %210, %183 : vector<16x32xf32>
    %212 = arith.addf %203, %211 : vector<16x32xf32>
    %c31_i32_86 = arith.constant 31 : i32
    %213 = tpu.dynamic_rotate %183 by %c31_i32_86 dim 1 : vector<16x32xf32>, i32 -> vector<16x32xf32>
    %cst_87 = arith.constant 0.000000e+00 : f32
    %214 = vector.shape_cast %4 : vector<1x32xi1> to vector<1x32xi1>
    %215 = vector.broadcast %214 : vector<1x32xi1> to vector<16x32xi1>
    %216 = vector.broadcast %cst_87 : f32 to vector<16x32xf32>
    %217 = arith.select %215, %213, %216 : vector<16x32xi1>, vector<16x32xf32>
    %cst_88 = arith.constant 0.0505822562 : f32
    %218 = vector.broadcast %cst_88 : f32 to vector<16x32xf32>
    %219 = arith.mulf %218, %217 : vector<16x32xf32>
    %220 = arith.addf %206, %219 : vector<16x32xf32>
    %cst_89 = arith.constant -0.158996388 : f32
    %221 = vector.broadcast %cst_89 : f32 to vector<16x32xf32>
    %222 = arith.mulf %221, %217 : vector<16x32xf32>
    %223 = arith.addf %209, %222 : vector<16x32xf32>
    %cst_90 = arith.constant 0.0940580964 : f32
    %224 = vector.broadcast %cst_90 : f32 to vector<16x32xf32>
    %225 = arith.mulf %224, %217 : vector<16x32xf32>
    %226 = arith.addf %212, %225 : vector<16x32xf32>
    %c1_i32_91 = arith.constant 1 : i32
    %227 = tpu.dynamic_rotate %160 by %c1_i32_91 dim 1 : vector<16x32xf32>, i32 -> vector<16x32xf32>
    %cst_92 = arith.constant 0.000000e+00 : f32
    %228 = vector.shape_cast %6 : vector<1x32xi1> to vector<1x32xi1>
    %229 = vector.broadcast %228 : vector<1x32xi1> to vector<16x32xi1>
    %230 = vector.broadcast %cst_92 : f32 to vector<16x32xf32>
    %231 = arith.select %229, %227, %230 : vector<16x32xi1>, vector<16x32xf32>
    %cst_93 = arith.constant -0.150144562 : f32
    %232 = vector.broadcast %cst_93 : f32 to vector<16x32xf32>
    %233 = arith.mulf %232, %231 : vector<16x32xf32>
    %234 = arith.addf %220, %233 : vector<16x32xf32>
    %cst_94 = arith.constant 0.186291948 : f32
    %235 = vector.broadcast %cst_94 : f32 to vector<16x32xf32>
    %236 = arith.mulf %235, %231 : vector<16x32xf32>
    %237 = arith.addf %223, %236 : vector<16x32xf32>
    %cst_95 = arith.constant 1.066350e-01 : f32
    %238 = vector.broadcast %cst_95 : f32 to vector<16x32xf32>
    %239 = arith.mulf %238, %231 : vector<16x32xf32>
    %240 = arith.addf %226, %239 : vector<16x32xf32>
    %cst_96 = arith.constant -0.155218467 : f32
    %241 = vector.broadcast %cst_96 : f32 to vector<16x32xf32>
    %242 = arith.mulf %241, %160 : vector<16x32xf32>
    %243 = arith.addf %234, %242 : vector<16x32xf32>
    %cst_97 = arith.constant 1.809610e-01 : f32
    %244 = vector.broadcast %cst_97 : f32 to vector<16x32xf32>
    %245 = arith.mulf %244, %160 : vector<16x32xf32>
    %246 = arith.addf %237, %245 : vector<16x32xf32>
    %cst_98 = arith.constant -0.0790447294 : f32
    %247 = vector.broadcast %cst_98 : f32 to vector<16x32xf32>
    %248 = arith.mulf %247, %160 : vector<16x32xf32>
    %249 = arith.addf %240, %248 : vector<16x32xf32>
    %c31_i32_99 = arith.constant 31 : i32
    %250 = tpu.dynamic_rotate %160 by %c31_i32_99 dim 1 : vector<16x32xf32>, i32 -> vector<16x32xf32>
    %cst_100 = arith.constant 0.000000e+00 : f32
    %251 = vector.shape_cast %4 : vector<1x32xi1> to vector<1x32xi1>
    %252 = vector.broadcast %251 : vector<1x32xi1> to vector<16x32xi1>
    %253 = vector.broadcast %cst_100 : f32 to vector<16x32xf32>
    %254 = arith.select %252, %250, %253 : vector<16x32xi1>, vector<16x32xf32>
    %cst_101 = arith.constant -0.0511633754 : f32
    %255 = vector.broadcast %cst_101 : f32 to vector<16x32xf32>
    %256 = arith.mulf %255, %254 : vector<16x32xf32>
    %257 = arith.addf %243, %256 : vector<16x32xf32>
    %cst_102 = arith.constant 0.080567196 : f32
    %258 = vector.broadcast %cst_102 : f32 to vector<16x32xf32>
    %259 = arith.mulf %258, %254 : vector<16x32xf32>
    %260 = arith.addf %246, %259 : vector<16x32xf32>
    %cst_103 = arith.constant 0.134600312 : f32
    %261 = vector.broadcast %cst_103 : f32 to vector<16x32xf32>
    %262 = arith.mulf %261, %254 : vector<16x32xf32>
    %263 = arith.addf %249, %262 : vector<16x32xf32>
    %c1_i32_104 = arith.constant 1 : i32
    %264 = tpu.dynamic_rotate %189 by %c1_i32_104 dim 1 : vector<16x32xf32>, i32 -> vector<16x32xf32>
    %cst_105 = arith.constant 0.000000e+00 : f32
    %265 = vector.shape_cast %6 : vector<1x32xi1> to vector<1x32xi1>
    %266 = vector.broadcast %265 : vector<1x32xi1> to vector<16x32xi1>
    %267 = vector.broadcast %cst_105 : f32 to vector<16x32xf32>
    %268 = arith.select %266, %264, %267 : vector<16x32xi1>, vector<16x32xf32>
    %cst_106 = arith.constant -0.0327491537 : f32
    %269 = vector.broadcast %cst_106 : f32 to vector<16x32xf32>
    %270 = arith.mulf %269, %268 : vector<16x32xf32>
    %271 = arith.addf %257, %270 : vector<16x32xf32>
    %cst_107 = arith.constant 0.183767065 : f32
    %272 = vector.broadcast %cst_107 : f32 to vector<16x32xf32>
    %273 = arith.mulf %272, %268 : vector<16x32xf32>
    %274 = arith.addf %260, %273 : vector<16x32xf32>
    %cst_108 = arith.constant 0.103536241 : f32
    %275 = vector.broadcast %cst_108 : f32 to vector<16x32xf32>
    %276 = arith.mulf %275, %268 : vector<16x32xf32>
    %277 = arith.addf %263, %276 : vector<16x32xf32>
    %cst_109 = arith.constant 0.107678711 : f32
    %278 = vector.broadcast %cst_109 : f32 to vector<16x32xf32>
    %279 = arith.mulf %278, %189 : vector<16x32xf32>
    %280 = arith.addf %271, %279 : vector<16x32xf32>
    %cst_110 = arith.constant -0.0731041208 : f32
    %281 = vector.broadcast %cst_110 : f32 to vector<16x32xf32>
    %282 = arith.mulf %281, %189 : vector<16x32xf32>
    %283 = arith.addf %274, %282 : vector<16x32xf32>
    %cst_111 = arith.constant -0.108525082 : f32
    %284 = vector.broadcast %cst_111 : f32 to vector<16x32xf32>
    %285 = arith.mulf %284, %189 : vector<16x32xf32>
    %286 = arith.addf %277, %285 : vector<16x32xf32>
    %c31_i32_112 = arith.constant 31 : i32
    %287 = tpu.dynamic_rotate %189 by %c31_i32_112 dim 1 : vector<16x32xf32>, i32 -> vector<16x32xf32>
    %cst_113 = arith.constant 0.000000e+00 : f32
    %288 = vector.shape_cast %4 : vector<1x32xi1> to vector<1x32xi1>
    %289 = vector.broadcast %288 : vector<1x32xi1> to vector<16x32xi1>
    %290 = vector.broadcast %cst_113 : f32 to vector<16x32xf32>
    %291 = arith.select %289, %287, %290 : vector<16x32xi1>, vector<16x32xf32>
    %cst_114 = arith.constant 0.0328158215 : f32
    %292 = vector.broadcast %cst_114 : f32 to vector<16x32xf32>
    %293 = arith.mulf %292, %291 : vector<16x32xf32>
    %294 = arith.addf %280, %293 : vector<16x32xf32>
    %cst_115 = arith.constant 0.0807360932 : f32
    %295 = vector.broadcast %cst_115 : f32 to vector<16x32xf32>
    %296 = arith.mulf %295, %291 : vector<16x32xf32>
    %297 = arith.addf %283, %296 : vector<16x32xf32>
    %cst_116 = arith.constant -0.0218769703 : f32
    %298 = vector.broadcast %cst_116 : f32 to vector<16x32xf32>
    %299 = arith.mulf %298, %291 : vector<16x32xf32>
    %300 = arith.addf %286, %299 : vector<16x32xf32>
    %c0_117 = arith.constant 0 : index
    %c2 = arith.constant 2 : index
    %301 = arith.index_cast %1 : i32 to index
    %c0_118 = arith.constant 0 : index
    %302 = vector.load %arg2[%c0_117, %c2, %301, %c0_118] : memref<1x3x32x32xf32, #tpu.memory_space<vmem>>, vector<1x1x16x32xf32>
    %303 = vector.shape_cast %302 : vector<1x1x16x32xf32> to vector<16x32xf32>
    %c1_i32_119 = arith.constant 1 : i32
    %304 = arith.subi %1, %c1_i32_119 : i32
    %c0_i32_120 = arith.constant 0 : i32
    %305 = arith.maxsi %304, %c0_i32_120 : i32
    %c0_121 = arith.constant 0 : index
    %c2_122 = arith.constant 2 : index
    %306 = arith.index_cast %305 : i32 to index
    %c0_123 = arith.constant 0 : index
    %307 = vector.load %arg2[%c0_121, %c2_122, %306, %c0_123] : memref<1x3x32x32xf32, #tpu.memory_space<vmem>>, vector<1x1x1x32xf32>
    %308 = vector.shape_cast %307 : vector<1x1x1x32xf32> to vector<1x32xf32>
    %c0_i32_124 = arith.constant 0 : i32
    %309 = arith.cmpi sgt, %1, %c0_i32_124 : i32
    %cst_125 = arith.constant 0.000000e+00 : f32
    %310 = vector.broadcast %cst_125 : f32 to vector<1x32xf32>
    %311 = arith.select %309, %308, %310 : vector<1x32xf32>
    %c16_i32_126 = arith.constant 16 : i32
    %312 = arith.addi %1, %c16_i32_126 : i32
    %c31_i32_127 = arith.constant 31 : i32
    %313 = arith.minsi %312, %c31_i32_127 : i32
    %c0_128 = arith.constant 0 : index
    %c2_129 = arith.constant 2 : index
    %314 = arith.index_cast %313 : i32 to index
    %c0_130 = arith.constant 0 : index
    %315 = vector.load %arg2[%c0_128, %c2_129, %314, %c0_130] : memref<1x3x32x32xf32, #tpu.memory_space<vmem>>, vector<1x1x1x32xf32>
    %316 = vector.shape_cast %315 : vector<1x1x1x32xf32> to vector<1x32xf32>
    %c16_i32_131 = arith.constant 16 : i32
    %317 = arith.addi %1, %c16_i32_131 : i32
    %c32_i32_132 = arith.constant 32 : i32
    %318 = arith.cmpi slt, %317, %c32_i32_132 : i32
    %cst_133 = arith.constant 0.000000e+00 : f32
    %319 = vector.broadcast %cst_133 : f32 to vector<1x32xf32>
    %320 = arith.select %318, %316, %319 : vector<1x32xf32>
    %c1_i32_134 = arith.constant 1 : i32
    %321 = tpu.dynamic_rotate %303 by %c1_i32_134 dim 0 : vector<16x32xf32>, i32 -> vector<16x32xf32>
    %322 = vector.shape_cast %9 : vector<16x1xi1> to vector<16x1xi1>
    %323 = vector.broadcast %322 : vector<16x1xi1> to vector<16x32xi1>
    %324 = vector.shape_cast %311 : vector<1x32xf32> to vector<1x32xf32>
    %325 = vector.broadcast %324 : vector<1x32xf32> to vector<16x32xf32>
    %326 = arith.select %323, %325, %321 : vector<16x32xi1>, vector<16x32xf32>
    %c15_i32_135 = arith.constant 15 : i32
    %327 = tpu.dynamic_rotate %303 by %c15_i32_135 dim 0 : vector<16x32xf32>, i32 -> vector<16x32xf32>
    %328 = vector.shape_cast %11 : vector<16x1xi1> to vector<16x1xi1>
    %329 = vector.broadcast %328 : vector<16x1xi1> to vector<16x32xi1>
    %330 = vector.shape_cast %320 : vector<1x32xf32> to vector<1x32xf32>
    %331 = vector.broadcast %330 : vector<1x32xf32> to vector<16x32xf32>
    %332 = arith.select %329, %331, %327 : vector<16x32xi1>, vector<16x32xf32>
    %c1_i32_136 = arith.constant 1 : i32
    %333 = tpu.dynamic_rotate %326 by %c1_i32_136 dim 1 : vector<16x32xf32>, i32 -> vector<16x32xf32>
    %cst_137 = arith.constant 0.000000e+00 : f32
    %334 = vector.shape_cast %6 : vector<1x32xi1> to vector<1x32xi1>
    %335 = vector.broadcast %334 : vector<1x32xi1> to vector<16x32xi1>
    %336 = vector.broadcast %cst_137 : f32 to vector<16x32xf32>
    %337 = arith.select %335, %333, %336 : vector<16x32xi1>, vector<16x32xf32>
    %cst_138 = arith.constant -0.0171754081 : f32
    %338 = vector.broadcast %cst_138 : f32 to vector<16x32xf32>
    %339 = arith.mulf %338, %337 : vector<16x32xf32>
    %340 = arith.addf %294, %339 : vector<16x32xf32>
    %cst_139 = arith.constant 0.107600667 : f32
    %341 = vector.broadcast %cst_139 : f32 to vector<16x32xf32>
    %342 = arith.mulf %341, %337 : vector<16x32xf32>
    %343 = arith.addf %297, %342 : vector<16x32xf32>
    %cst_140 = arith.constant -0.164984941 : f32
    %344 = vector.broadcast %cst_140 : f32 to vector<16x32xf32>
    %345 = arith.mulf %344, %337 : vector<16x32xf32>
    %346 = arith.addf %300, %345 : vector<16x32xf32>
    %cst_141 = arith.constant -0.134279862 : f32
    %347 = vector.broadcast %cst_141 : f32 to vector<16x32xf32>
    %348 = arith.mulf %347, %326 : vector<16x32xf32>
    %349 = arith.addf %340, %348 : vector<16x32xf32>
    %cst_142 = arith.constant -0.163631707 : f32
    %350 = vector.broadcast %cst_142 : f32 to vector<16x32xf32>
    %351 = arith.mulf %350, %326 : vector<16x32xf32>
    %352 = arith.addf %343, %351 : vector<16x32xf32>
    %cst_143 = arith.constant -0.00274205441 : f32
    %353 = vector.broadcast %cst_143 : f32 to vector<16x32xf32>
    %354 = arith.mulf %353, %326 : vector<16x32xf32>
    %355 = arith.addf %346, %354 : vector<16x32xf32>
    %c31_i32_144 = arith.constant 31 : i32
    %356 = tpu.dynamic_rotate %326 by %c31_i32_144 dim 1 : vector<16x32xf32>, i32 -> vector<16x32xf32>
    %cst_145 = arith.constant 0.000000e+00 : f32
    %357 = vector.shape_cast %4 : vector<1x32xi1> to vector<1x32xi1>
    %358 = vector.broadcast %357 : vector<1x32xi1> to vector<16x32xi1>
    %359 = vector.broadcast %cst_145 : f32 to vector<16x32xf32>
    %360 = arith.select %358, %356, %359 : vector<16x32xi1>, vector<16x32xf32>
    %cst_146 = arith.constant 0.00935572758 : f32
    %361 = vector.broadcast %cst_146 : f32 to vector<16x32xf32>
    %362 = arith.mulf %361, %360 : vector<16x32xf32>
    %363 = arith.addf %349, %362 : vector<16x32xf32>
    %cst_147 = arith.constant 0.102631643 : f32
    %364 = vector.broadcast %cst_147 : f32 to vector<16x32xf32>
    %365 = arith.mulf %364, %360 : vector<16x32xf32>
    %366 = arith.addf %352, %365 : vector<16x32xf32>
    %cst_148 = arith.constant -0.0436910354 : f32
    %367 = vector.broadcast %cst_148 : f32 to vector<16x32xf32>
    %368 = arith.mulf %367, %360 : vector<16x32xf32>
    %369 = arith.addf %355, %368 : vector<16x32xf32>
    %c1_i32_149 = arith.constant 1 : i32
    %370 = tpu.dynamic_rotate %303 by %c1_i32_149 dim 1 : vector<16x32xf32>, i32 -> vector<16x32xf32>
    %cst_150 = arith.constant 0.000000e+00 : f32
    %371 = vector.shape_cast %6 : vector<1x32xi1> to vector<1x32xi1>
    %372 = vector.broadcast %371 : vector<1x32xi1> to vector<16x32xi1>
    %373 = vector.broadcast %cst_150 : f32 to vector<16x32xf32>
    %374 = arith.select %372, %370, %373 : vector<16x32xi1>, vector<16x32xf32>
    %cst_151 = arith.constant 3.303010e-02 : f32
    %375 = vector.broadcast %cst_151 : f32 to vector<16x32xf32>
    %376 = arith.mulf %375, %374 : vector<16x32xf32>
    %377 = arith.addf %363, %376 : vector<16x32xf32>
    %cst_152 = arith.constant 0.0592007712 : f32
    %378 = vector.broadcast %cst_152 : f32 to vector<16x32xf32>
    %379 = arith.mulf %378, %374 : vector<16x32xf32>
    %380 = arith.addf %366, %379 : vector<16x32xf32>
    %cst_153 = arith.constant 0.0190361291 : f32
    %381 = vector.broadcast %cst_153 : f32 to vector<16x32xf32>
    %382 = arith.mulf %381, %374 : vector<16x32xf32>
    %383 = arith.addf %369, %382 : vector<16x32xf32>
    %cst_154 = arith.constant -0.00879218429 : f32
    %384 = vector.broadcast %cst_154 : f32 to vector<16x32xf32>
    %385 = arith.mulf %384, %303 : vector<16x32xf32>
    %386 = arith.addf %377, %385 : vector<16x32xf32>
    %cst_155 = arith.constant -0.167610779 : f32
    %387 = vector.broadcast %cst_155 : f32 to vector<16x32xf32>
    %388 = arith.mulf %387, %303 : vector<16x32xf32>
    %389 = arith.addf %380, %388 : vector<16x32xf32>
    %cst_156 = arith.constant -0.173542708 : f32
    %390 = vector.broadcast %cst_156 : f32 to vector<16x32xf32>
    %391 = arith.mulf %390, %303 : vector<16x32xf32>
    %392 = arith.addf %383, %391 : vector<16x32xf32>
    %c31_i32_157 = arith.constant 31 : i32
    %393 = tpu.dynamic_rotate %303 by %c31_i32_157 dim 1 : vector<16x32xf32>, i32 -> vector<16x32xf32>
    %cst_158 = arith.constant 0.000000e+00 : f32
    %394 = vector.shape_cast %4 : vector<1x32xi1> to vector<1x32xi1>
    %395 = vector.broadcast %394 : vector<1x32xi1> to vector<16x32xi1>
    %396 = vector.broadcast %cst_158 : f32 to vector<16x32xf32>
    %397 = arith.select %395, %393, %396 : vector<16x32xi1>, vector<16x32xf32>
    %cst_159 = arith.constant 0.0415585451 : f32
    %398 = vector.broadcast %cst_159 : f32 to vector<16x32xf32>
    %399 = arith.mulf %398, %397 : vector<16x32xf32>
    %400 = arith.addf %386, %399 : vector<16x32xf32>
    %cst_160 = arith.constant 0.124390513 : f32
    %401 = vector.broadcast %cst_160 : f32 to vector<16x32xf32>
    %402 = arith.mulf %401, %397 : vector<16x32xf32>
    %403 = arith.addf %389, %402 : vector<16x32xf32>
    %cst_161 = arith.constant 0.0237575136 : f32
    %404 = vector.broadcast %cst_161 : f32 to vector<16x32xf32>
    %405 = arith.mulf %404, %397 : vector<16x32xf32>
    %406 = arith.addf %392, %405 : vector<16x32xf32>
    %c1_i32_162 = arith.constant 1 : i32
    %407 = tpu.dynamic_rotate %332 by %c1_i32_162 dim 1 : vector<16x32xf32>, i32 -> vector<16x32xf32>
    %cst_163 = arith.constant 0.000000e+00 : f32
    %408 = vector.shape_cast %6 : vector<1x32xi1> to vector<1x32xi1>
    %409 = vector.broadcast %408 : vector<1x32xi1> to vector<16x32xi1>
    %410 = vector.broadcast %cst_163 : f32 to vector<16x32xf32>
    %411 = arith.select %409, %407, %410 : vector<16x32xi1>, vector<16x32xf32>
    %cst_164 = arith.constant 0.00983154122 : f32
    %412 = vector.broadcast %cst_164 : f32 to vector<16x32xf32>
    %413 = arith.mulf %412, %411 : vector<16x32xf32>
    %414 = arith.addf %400, %413 : vector<16x32xf32>
    %cst_165 = arith.constant 0.0228692964 : f32
    %415 = vector.broadcast %cst_165 : f32 to vector<16x32xf32>
    %416 = arith.mulf %415, %411 : vector<16x32xf32>
    %417 = arith.addf %403, %416 : vector<16x32xf32>
    %cst_166 = arith.constant 0.0164684318 : f32
    %418 = vector.broadcast %cst_166 : f32 to vector<16x32xf32>
    %419 = arith.mulf %418, %411 : vector<16x32xf32>
    %420 = arith.addf %406, %419 : vector<16x32xf32>
    %cst_167 = arith.constant -0.0412387811 : f32
    %421 = vector.broadcast %cst_167 : f32 to vector<16x32xf32>
    %422 = arith.mulf %421, %332 : vector<16x32xf32>
    %423 = arith.addf %414, %422 : vector<16x32xf32>
    %cst_168 = arith.constant 0.0314124711 : f32
    %424 = vector.broadcast %cst_168 : f32 to vector<16x32xf32>
    %425 = arith.mulf %424, %332 : vector<16x32xf32>
    %426 = arith.addf %417, %425 : vector<16x32xf32>
    %cst_169 = arith.constant -0.0809823945 : f32
    %427 = vector.broadcast %cst_169 : f32 to vector<16x32xf32>
    %428 = arith.mulf %427, %332 : vector<16x32xf32>
    %429 = arith.addf %420, %428 : vector<16x32xf32>
    %c31_i32_170 = arith.constant 31 : i32
    %430 = tpu.dynamic_rotate %332 by %c31_i32_170 dim 1 : vector<16x32xf32>, i32 -> vector<16x32xf32>
    %cst_171 = arith.constant 0.000000e+00 : f32
    %431 = vector.shape_cast %4 : vector<1x32xi1> to vector<1x32xi1>
    %432 = vector.broadcast %431 : vector<1x32xi1> to vector<16x32xi1>
    %433 = vector.broadcast %cst_171 : f32 to vector<16x32xf32>
    %434 = arith.select %432, %430, %433 : vector<16x32xi1>, vector<16x32xf32>
    %cst_172 = arith.constant 0.0914321318 : f32
    %435 = vector.broadcast %cst_172 : f32 to vector<16x32xf32>
    %436 = arith.mulf %435, %434 : vector<16x32xf32>
    %437 = arith.addf %423, %436 : vector<16x32xf32>
    %cst_173 = arith.constant 0.105146579 : f32
    %438 = vector.broadcast %cst_173 : f32 to vector<16x32xf32>
    %439 = arith.mulf %438, %434 : vector<16x32xf32>
    %440 = arith.addf %426, %439 : vector<16x32xf32>
    %cst_174 = arith.constant -0.105439775 : f32
    %441 = vector.broadcast %cst_174 : f32 to vector<16x32xf32>
    %442 = arith.mulf %441, %434 : vector<16x32xf32>
    %443 = arith.addf %429, %442 : vector<16x32xf32>
    %cst_175 = arith.constant 0.000000e+00 : f32
    %444 = vector.broadcast %cst_175 : f32 to vector<16x32xf32>
    %445 = arith.maximumf %437, %444 : vector<16x32xf32>
    %c15_i32_176 = arith.constant 15 : i32
    %446 = tpu.dynamic_rotate %445 by %c15_i32_176 dim 0 : vector<16x32xf32>, i32 -> vector<16x32xf32>
    %447 = arith.maximumf %445, %446 : vector<16x32xf32>
    %c31_i32_177 = arith.constant 31 : i32
    %448 = tpu.dynamic_rotate %447 by %c31_i32_177 dim 1 : vector<16x32xf32>, i32 -> vector<16x32xf32>
    %449 = arith.maximumf %447, %448 : vector<16x32xf32>
    %c0_178 = arith.constant 0 : index
    %c0_179 = arith.constant 0 : index
    %450 = vector.load %arg5[%c0_178, %c0_179] : memref<48x32xf32, #tpu.memory_space<vmem>>, vector<16x32xf32>
    tpu.vector_store %arg5[%c0_178, %c0_179], %449 {strides = array<i32>} : memref<48x32xf32, #tpu.memory_space<vmem>>, vector<16x32xf32>,
    %cst_180 = arith.constant 0.000000e+00 : f32
    %451 = vector.broadcast %cst_180 : f32 to vector<16x32xf32>
    %452 = arith.maximumf %440, %451 : vector<16x32xf32>
    %c15_i32_181 = arith.constant 15 : i32
    %453 = tpu.dynamic_rotate %452 by %c15_i32_181 dim 0 : vector<16x32xf32>, i32 -> vector<16x32xf32>
    %454 = arith.maximumf %452, %453 : vector<16x32xf32>
    %c31_i32_182 = arith.constant 31 : i32
    %455 = tpu.dynamic_rotate %454 by %c31_i32_182 dim 1 : vector<16x32xf32>, i32 -> vector<16x32xf32>
    %456 = arith.maximumf %454, %455 : vector<16x32xf32>
    %c16 = arith.constant 16 : index
    %c0_183 = arith.constant 0 : index
    %457 = vector.load %arg5[%c16, %c0_183] : memref<48x32xf32, #tpu.memory_space<vmem>>, vector<16x32xf32>
    tpu.vector_store %arg5[%c16, %c0_183], %456 {strides = array<i32>} : memref<48x32xf32, #tpu.memory_space<vmem>>, vector<16x32xf32>,
    %cst_184 = arith.constant 0.000000e+00 : f32
    %458 = vector.broadcast %cst_184 : f32 to vector<16x32xf32>
    %459 = arith.maximumf %443, %458 : vector<16x32xf32>
    %c15_i32_185 = arith.constant 15 : i32
    %460 = tpu.dynamic_rotate %459 by %c15_i32_185 dim 0 : vector<16x32xf32>, i32 -> vector<16x32xf32>
    %461 = arith.maximumf %459, %460 : vector<16x32xf32>
    %c31_i32_186 = arith.constant 31 : i32
    %462 = tpu.dynamic_rotate %461 by %c31_i32_186 dim 1 : vector<16x32xf32>, i32 -> vector<16x32xf32>
    %463 = arith.maximumf %461, %462 : vector<16x32xf32>
    %c32 = arith.constant 32 : index
    %c0_187 = arith.constant 0 : index
    %464 = vector.load %arg5[%c32, %c0_187] : memref<48x32xf32, #tpu.memory_space<vmem>>, vector<16x32xf32>
    tpu.vector_store %arg5[%c32, %c0_187], %463 {strides = array<i32>} : memref<48x32xf32, #tpu.memory_space<vmem>>, vector<16x32xf32>,
    %c0_188 = arith.constant 0 : index
    %c0_189 = arith.constant 0 : index
    %465 = tpu.strided_load %arg5[%c0_188, %c0_189] {strides = array<i32: 2, 1>} : memref<48x32xf32, #tpu.memory_space<vmem>>, vector<24x32xf32>
    %c0_190 = arith.constant 0 : index
    %c0_191 = arith.constant 0 : index
    %466 = vector.load %arg3[%c0_190, %c0_191] : memref<32x16xf32, #tpu.memory_space<vmem>>, vector<32x16xf32>
    %cst_192 = arith.constant dense<0.000000e+00> : vector<24x16xf32>
    %467 = tpu.matmul %465, %466, %cst_192 {dimension_numbers = #tpu.dot_dimension_numbers<[1], [0], [0], [1], [0, 0, 1, 1], [], []>} : vector<24x32xf32>, vector<32x16xf32>, vector<24x16xf32> -> vector<24x16xf32>
    %468 = vector.shape_cast %467 : vector<24x16xf32> to vector<3x8x16xf32>
    %c0_193 = arith.constant 0 : index
    %c0_194 = arith.constant 0 : index
    %c0_195 = arith.constant 0 : index
    %c0_196 = arith.constant 0 : index
    %469 = vector.load %arg4[%c0_193, %c0_194, %c0_195, %c0_196] : memref<1x3x8x16xf32, #tpu.memory_space<vmem>>, vector<1x3x8x16xf32>
    %470 = vector.shape_cast %469 : vector<1x3x8x16xf32> to vector<3x8x16xf32>
    %471 = vector.shape_cast %468 : vector<3x8x16xf32> to vector<1x3x8x16xf32>
    tpu.vector_store %arg4[%c0_193, %c0_194, %c0_195, %c0_196], %471 {strides = array<i32>} : memref<1x3x8x16xf32, #tpu.memory_space<vmem>>, vector<1x3x8x16xf32>,
    return
  }
  func.func @transform_0(%arg0: i32, %arg1: i32) -> (i32, i32, i32, i32) {
    %c0_i32 = arith.constant 0 : i32
    %c0_i32_0 = arith.constant 0 : i32
    %c0_i32_1 = arith.constant 0 : i32
    %c0_i32_2 = arith.constant 0 : i32
    return %arg0, %c0_i32, %c0_i32_0, %c0_i32_1 : i32, i32, i32, i32
  }
  func.func @transform_1(%arg0: i32, %arg1: i32) -> (i32, i32) {
    %c0_i32 = arith.constant 0 : i32
    %c0_i32_0 = arith.constant 0 : i32
    %c0_i32_1 = arith.constant 0 : i32
    return %c0_i32, %c0_i32_0 : i32, i32
  }
  func.func @transform_2(%arg0: i32, %arg1: i32) -> (i32, i32, i32, i32) {
    %c0_i32 = arith.constant 0 : i32
    %c0_i32_0 = arith.constant 0 : i32
    %c0_i32_1 = arith.constant 0 : i32
    return %arg0, %c0_i32, %arg1, %c0_i32_0 : i32, i32, i32, i32
  }
}

</mosaic_0001>

<bundles_post_ra>
// kernel: tpu_custom_call.1
= control target key start
LH: loop header
LB: loop body
LE: loop exit
PB: predicated region body
PF: predicated region fallthrough
CT: control target
= control target key end

     0   :  { %7 = vsyncpa [#allocation4], 0  ;;  %s2596_s0 = inlined_call_operand.hbm [shape: f32[2,3,32,32], index: 0, kind: input, shape index: {}]   ;;  %s2597_s1 = inlined_call_operand.vmem [shape: f32[32,16], index: 1, kind: input, shape index: {}]   ;;  %s2598_s2 = inlined_call_operand.hbm [shape: f32[2,3,16,16], index: 2, kind: output, shape index: {}]  }
   0x1   :  { %9 = vsyncpa [#allocation4 + $0x1], 0 }
   0x2   :  { %10 = vsyncpa [#allocation5], 0 }
   0x3   :  { %12 = vsyncpa [#allocation5 + $0x1], 0  ;;  %s1580_s9 = smov 0   ;;  %s1582_s10 = smov 0  }
   0x4   :  { %s1584_s11 = smov 0   ;;  %s1586_s12 = smov 0  }
   0x5   :  { %s1588_s13 = smov 0   ;;  %s1590_s14 = smov 0  }
   0x6   :  { %s1592_s15 = smov 0   ;;  %s1594_s16 = smov 0  }
   0x7   :  { %s1596_s17 = smov 0   ;;  %s1598_s18 = smov 0  }
   0x8   :  { %s1600_s19 = smov 0  }
   0x9 LB: > { %s1222_s20 = sadd.s32 4294967295, %s1550_s19   ;;  %s1223_s21 = sadd.s32 4294967294, %s1550_s19   ;;  %s1550_s19 = sphi %s1600_s19, %s18_s19   ;;  %s1546_s18 = sphi %s1598_s18, %s2688_s18   ;;  %s1542_s17 = sphi %s1596_s17, %s2687_s17   ;;  %s1538_s16 = sphi %s1594_s16, %s2686_s16   ;;  %s1534_s15 = sphi %s1592_s15, %s2685_s15   ;;  %s1530_s14 = sphi %s1590_s14, %s2684_s14   ;;  %s1526_s13 = sphi %s1588_s13, %s2683_s13   ;;  %s1522_s12 = sphi %s1586_s12, %s2682_s12   ;;  %s1518_s11 = sphi %s1584_s11, %s2681_s11   ;;  %s1514_s10 = sphi %s1582_s10, %s2680_s10   ;;  %s1510_s9 = sphi %s1580_s9, %s2679_s9  }
   0xa   : > { %s27_s22 = sadd.s32 1, %s1542_s17  ;;  %s30_s23 = sadd.s32 1, %s1546_s18 }
   0xb   : > { %p28_p0 = scmp.ge.s32.totalorder %s27_s22, 2  ;;  %s37_s24 = sadd.s32 1, %s1530_s14 }
   0xc   : > { %p44_p1 = scmp.ne.s32.totalorder %s1530_s14, %s1526_s13  ;;  %p45_p2 = scmp.eq.s32.totalorder %s1550_s19, 0 }
   0xd   : > { %s2690_s22 = smov (%p28_p0, %s27_s22), 0  ;;  %s2692_s23 = smov (!%p28_p0, %s30_s23), %s1546_s18 }
   0xe   : > { %p1644_p3 = por %p45_p2, %p44_p1  ;;  %p50_p4 = scmp.ne.s32.totalorder %s1526_s13, %s1522_s12 }
   0xf   : > { %p32_p5 = scmp.ge.s32.totalorder %s2692_s23, 2  ;;  %p51_p6 = scmp.eq.s32.totalorder %s1222_s20, 0 }
  0x10   : > { %s82_s26 = ssub.s32 %s1542_s17, %s2690_s22  ;;  %s86_s27 = sadd.s32 1, %s1518_s11 }
  0x11   : > { %s2694_s23 = smov (%p32_p5, %s2692_s23), 0  ;;  %p1654_p7 = por %p51_p6, %p50_p4 }
  0x12   : > { %2604 = sst [smem:[#allocation9_spill]] %s2694_s23  ;;  %p96_p8 = scmp.ne.s32.totalorder %s1518_s11, %s1514_s10 }
  0x13   : > { %s34_s29 = ssub.s32 %s1546_s18, %s2694_s23  ;;  %p97_p9 = scmp.eq.s32.totalorder %s1222_s20, 3 }
  0x14   : > { %p35_p10 = scmp.eq.s32.totalorder %s34_s29, 0  ;;  %s83_s30 = sor.u32 %s82_s26, %s34_s29 }
  0x15   : > { %p84_p11 = scmp.eq.s32.totalorder %s83_s30, 0  ;;  %p1662_p12 = por %p97_p9, %p96_p8 }
  0x16   : > { %s1667_s4 = scalar_select %p35_p10, %s1530_s14, %s37_s24  }
  0x17   : > { %s2606_s3 = scalar_select %p1662_p12, 1, 0 }
  0x18   : > { %s1670_s5 = scalar_select %p84_p11, %s1518_s11, %s86_s27  }
  0x19   : > { %p102_p13 = scmp.ne.s32.totalorder %s1514_s10, %s1510_s9  ;;  %p103_p0 = scmp.eq.s32.totalorder %s1223_s21, 3 }
  0x1a   : > { %p1297_p1 = scmp.lt.s32.totalorder %s1550_s19, 4  ;;  %s126_s7 = sand.u32 1, %s1530_s14  }
  0x1b   : > { %p1675_p2 = por %p103_p0, %p102_p13  ;;  %s1280_s8 = smul.u32 96, %s126_s7 }
  0x1c   : > { %s1281_s12 = smul.u32 1536, %s1546_s18  ;;  %p1683_p4 = pnand %p1297_p1, %p1644_p3 }
  0x1d   : > { %s2607_s6 = scalar_select %p1675_p2, 1, 0 }
  0x1e   : > { %s1690_s27 = scalar_lea.hbm %s2596_s0, %s1281_s12  ;;  %s130_s21 = scalar_lea.vmem [#allocation3], %s1280_s8 }
  0x1f   : > { %s137_s29 = sshll.u32 %s130_s21, 4  ;;  %s1695_s25 = scalar_lea.sflag [#allocation4], %s126_s7  ;;  %s1692_s29 = int_to_ptr.vmem [resolvable:$true] %s137_s29 }
  0x20   : > { %s1398_s30 = scalar_lea.hbm %s1690_s27, 1536  ;;  %p1400_p6 = pneg %p1683_p4 }
  0x21   : > { %p1399_p3 = scmp.ne.s32.totalorder %s1690_s27, %s1398_s30  ;;  %s1403_s24 = scalar_lea.hbm %s2596_s0, 3072 }
  0x22   : > { %p1404_p10 = scmp.lt.u32.totalorder %s1690_s27, %s2596_s0  ;;  %p1405_p11 = scmp.lt.u32.totalorder %s1403_s24, %s1398_s30 }
  0x23   : > { %p1401_p8 = pnand %p1400_p6, %p1399_p3  ;;  %p1407_p0 = scmp.lt.u32.totalorder %s1398_s30, %s1690_s27 }
  0x24   : > { %p1406_p13 = por %p1405_p11, %p1404_p10 }
  0x25   : > { %p1402_p9 = pneg %p1401_p8 }
  0x26   : > { %p1408_p1 = por %p1407_p0, %p1406_p13 }
  0x28   : > { %p1409_p5 = pnand %p1408_p1, %p1402_p9 }
  0x2a   : > { %1412 = shalt.err (!%p1409_p5)
}
  0x2b   : > { %s1413_s7 = scalar_lea.vmem %s1692_s29, 1536  ;;  %s1552_s21 = smov [#allocation3]  }
  0x2c   : > { %p1414_p3 = scmp.ne.s32.totalorder %s1692_s29, %s1413_s7  ;;  %s1418_s12 = sshll.u32 %s1552_s21, 4  ;;  %s1419_s12 = int_to_ptr.vmem [resolvable:$false] %s1418_s12 }
  0x2d   : > { %s1420_s23 = scalar_lea.vmem %s1419_s12, 3072  ;;  %p1421_p12 = scmp.lt.s32.totalorder %s1692_s29, %s1419_s12 }
  0x2e   : > { %p1416_p8 = pnand %p1414_p3, %p1400_p6  ;;  %p1422_p10 = scmp.lt.s32.totalorder %s1420_s23, %s1413_s7 }
  0x30   : > { %p1417_p2 = pneg %p1416_p8  ;;  %p1423_p11 = por %p1422_p10, %p1421_p12 }
  0x32   : > { %p1424_p13 = pnand %p1423_p11, %p1417_p2 }
  0x34   : > { %1427 = shalt.err (!%p1424_p13)
}
  0x35   : > { %s1553_s30 = smov 128   ;;  %s1554_s26 = smov 8  }
  0x36   : > { %1292 = dma.hbm_to_vmem [thread:$0]  (!%p1683_p4), %s1690_s27, 1536, %s1692_s29, %s1695_s25, %s1553_s30, %s1553_s30, %s1554_s26  }
  0x37   : > { %p145_p5 = scmp.lt.s32.totalorder %s1550_s19, 5  ;;  %p2609_p6 = scmp.ge.s32.totalorder %s1550_s19, 1 }
  0x39   : > { %p146_p9 = pnand %p2609_p6, %p145_p5 }
  0x3b   : > { %149 = sbr.rel (%p146_p9) target bundleno = 1124 (0x464), region = 28 }
  0x42   : > { %s151_s24 = sand.u32 1, %s1526_s13  }
  0x43   : > { %s1282_s8 = smul.u32 96, %s151_s24  ;;  %s152_s7 = scalar_lea.sflag [#allocation4], %s151_s24 }
  0x45   : > { %s1727_s21 = scalar_lea.vmem [#allocation3], %s1282_s8 }
  0x46   : > { %1501 = dma.done.wait (%p1654_p7), %s152_s7, 1536  }
  0x47   : > { %1503 = vsyncadd (%p1654_p7), %s152_s7, 4294965760  ;;  %s1228_s20 = sshll.u32 %s1534_s15, 4  ;;  %v177_v0 = vlaneseq  ;;  %s1555_s23 = smov 32   ;;  %vm241_vm6 = vcmask 1047808   ;;  %vm1559_vm9 = vmmov 0   ;;  %vm934_vm10 = vcmask 261120  }
  0x48   : > { %s1229_s27 = sadd.s32 4294967295, %s1228_s20  ;;  %p196_p2 = scmp.gt.s32.totalorder %s1228_s20, 0  ;;  %vm1099_vm11 = vcmask 130048  }
  0x49   : > { %v1735_v1 = vshrl.u32 %v177_v0, 7  ;;  %p192_p12 = scmp.gt.s32.totalorder %s1229_s27, 0  ;;  %s1738_s29 = scalar_lea.vmem %s1727_s21, %s1228_s20 [#allocation3] }
  0x4a   : > { %s201_s25 = sadd.s32 16, %s1228_s20  ;;  %v1747_v3 = vld [vmem:[%s1738_s29] sm:$0xff]  ;;  %v1750_v4 = vld [vmem:[%s1738_s29 + $0x8] sm:$0xff]  ;;  %s1556_s24 = smov 97  }
  0x4b   : > { %2610 = vst [vmem:[#allocation10_spill] sm:$0xff] %v1735_v1  ;;  %s2696_s27 = smov (!%p192_p12, %s1229_s27), 0  ;;  %v1744_v2 = vsub.s32 0, %v1735_v1  ;;  %p202_p7 = scmp.lt.s32.totalorder %s201_s25, 31  ;;  %vm213_vm0 = vcmp.lt.s32.totalorder %v1735_v1, 1  ;;  %v211_v8 = vrot.slane %v1747_v3, 7  ;;  %312 = vrot.lane.b32.xlu1 %v1747_v3, %s1555_s23 }
  0x4c   : > { %s197_s12 = scalar_select %p196_p2, 1, 0  ;;  %v212_v9 = vrot.slane %v1750_v4, 7  ;;  %vm184_vm2 = vcmp.eq.s32.totalorder %v1735_v1, 0  ;;  %v1766_v11 = vadd.s32 8, %v1735_v1  ;;  %v226_v14 = vrot.slane %v1747_v3, 1 }
  0x4d   : > { %s1741_s28 = scalar_lea.vmem %s1727_s21, %s2696_s27 [#allocation3]  ;;  %p206_p4 = scmp.lt.s32.totalorder %s201_s25, 32  ;;  %v227_v15 = vrot.slane %v1750_v4, 1  ;;  %v1778_v18 = vld [vmem:[%s1738_s29 + $0x20] sm:$0xff]  ;;  %v1781_v19 = vld [vmem:[%s1738_s29 + $0x28] sm:$0xff]  ;;  %vm228_vm3 = vcmp.lt.s32.totalorder %v1735_v1, 7 }
  0x4e   : > { %v195_v5 = vld [vmem:[%s1741_s28] sm:$0x1]  ;;  %v198_v6 = vstv %s197_s12  ;;  %s2698_s25 = smov (!%p202_p7, %s201_s25), 31  ;;  %v215_v12 = vsel %vm213_vm0, %v212_v9, %v211_v8  ;;  %vm187_vm5 = vcmp.eq.s32.totalorder %v1766_v11, 15  ;;  %v1804_v25 = vsel %vm213_vm0, %v211_v8, %v212_v9  ;;  %v1850_v43 = vld [vmem:[%s1738_s29 + $0x48] sm:$0xff]  ;;  %s1557_s8 = smov 127  }
  0x4f   : > { %vm1754_vm1 = vcmp.eq.s32.totalorder %v198_v6, 1  ;;  %s207_s30 = scalar_select %p206_p4, 1, 0  ;;  %315 = vrot.lane.b32.xlu1 %v1750_v4, %s1555_s23  ;;  %v1233_v22 = vld [vmem:[%s1741_s28 + $0x20] sm:$0x1]  ;;  %v230_v24 = vsel %vm228_vm3, %v227_v15, %v226_v14  ;;  %v456_v27 = vrot.slane %v1778_v18, 7  ;;  %v1822_v32 = vsel %vm228_vm3, %v226_v14, %v227_v15 }
  0x50   : > { %v200_v10 = vsel %vm1754_vm1, %v195_v5, 0.0  ;;  %s1772_s26 = scalar_lea.vmem %s1727_s21, %s2698_s25 [#allocation3]  ;;  %v457_v28 = vrot.slane %v1781_v19, 7  ;;  %v451_v29 = vsel %vm1754_vm1, %v1233_v22, 0.0  ;;  %v466_v37 = vrot.slane %v1778_v18, 1  ;;  %v1847_v42 = vld [vmem:[%s1738_s29 + $0x40] sm:$0xff]  ;;  %p2676_p1 = scmp.ne.s32.totalorder %s2606_s3, 0 }
  0x51   : > { %v223_v13 = vrot.slane %v200_v10, %v1744_v2  ;;  %v205_v16 = vld [vmem:[%s1772_s26] sm:$0x1]  ;;  %v208_v17 = vstv %s207_s30  ;;  %v463_v34 = vrot.slane %v451_v29, %v1744_v2  ;;  %v467_v38 = vrot.slane %v1781_v19, 1  ;;  %s1561_s25 = smov [#allocation6]  }
  0x52   : > { %vm1790_vm4 = vcmp.eq.s32.totalorder %v208_v17, 1  ;;  %v1234_v31 = vld [vmem:[%s1772_s26 + $0x20] sm:$0x1]  ;;  %v1826_v33 = vsel %vm213_vm0, %v456_v27, %v457_v28  ;;  %v459_v35 = vsel %vm213_vm0, %v457_v28, %v456_v27  ;;  %v686_v47 = vrot.slane %v1847_v42, 7  ;;  %s1432_s12 = sshll.u32 %s1561_s25, 4  ;;  %s1433_s12 = int_to_ptr.vmem [resolvable:$false] %s1432_s12 }
  0x53   : > { %v1785_v20 = vsel %vm184_vm2, %v223_v13, %v215_v12  ;;  %v210_v23 = vsel %vm1790_vm4, %v205_v16, 0.0  ;;  %v455_v36 = vsel %vm1790_vm4, %v1234_v31, 0.0  ;;  %v1841_v39 = vsel %vm184_vm2, %v463_v34, %v459_v35  ;;  %v1238_v44 = vld [vmem:[%s1741_s28 + $0x40] sm:$0x1]  ;;  %s1434_s28 = scalar_lea.vmem %s1433_s12, 768 }
  0x54   : > { %242 = vrot.lane.b32.xlu0 %v1785_v20, %s1555_s23  ;;  %v238_v26 = vrot.slane %v210_v23, %v1744_v2  ;;  %v473_v40 = vrot.slane %v455_v36, %v1744_v2  ;;  %v469_v41 = vsel %vm228_vm3, %v467_v38, %v466_v37  ;;  %v681_v46 = vsel %vm1754_vm1, %v1238_v44, 0.0  ;;  %v1239_v49 = vld [vmem:[%s1772_s26 + $0x40] sm:$0x1]  ;;  %s1284_s26 = smul.u32 6, %s1538_s16 }
  0x55   : > { %v687_v48 = vrot.slane %v1850_v43, 7  ;;  %v1872_v50 = vsel %vm228_vm3, %v466_v37, %v467_v38  ;;  %v693_v51 = vrot.slane %v681_v46, %v1744_v2  ;;  %v685_v54 = vsel %vm1790_vm4, %v1239_v49, 0.0 }
  0x56   : > { %v1813_v30 = vsel %vm187_vm5, %v238_v26, %v230_v24  ;;  %v1859_v45 = vsel %vm187_vm5, %v473_v40, %v469_v41  ;;  %v696_v55 = vrot.slane %v1847_v42, 1  ;;  %v697_v56 = vrot.slane %v1850_v43, 1 }
  0x57   : > { %381 = vrot.lane.b32.xlu1 %v1813_v30, %s1555_s23  ;;  %v1877_v52 = vsel %vm213_vm0, %v686_v47, %v687_v48  ;;  %v689_v53 = vsel %vm213_vm0, %v687_v48, %v686_v47  ;;  %v703_v58 = vrot.slane %v685_v54, %v1744_v2 }
  0x58   : > { %245 = vrot.lane.b32.xlu0 %v1804_v25, %s1555_s23  ;;  %v1891_v57 = vsel %vm184_vm2, %v693_v51, %v689_v53  ;;  %v699_v59 = vsel %vm228_vm3, %v697_v56, %v696_v55  ;;  %v1910_v61 = vsel %vm228_vm3, %v696_v55, %v697_v56 }
  0x59   : > { %v1902_v60 = vsel %vm187_vm5, %v703_v58, %v699_v59 }
  0x5b   : > { %479 = vrot.lane.b32.xlu1 %v1826_v33, %s1555_s23 }
  0x5c   : > { %378 = vrot.lane.b32.xlu0 %v1822_v32, %s1555_s23 }
  0x5f   : > { %545 = vrot.lane.b32.xlu1 %v1781_v19, %s1555_s23 }
  0x60   : > { %476 = vrot.lane.b32.xlu0 %v1841_v39, %s1555_s23 }
  0x63   : > { %611 = vrot.lane.b32.xlu1 %v1859_v45, %s1555_s23 }
  0x64   : > { %542 = vrot.lane.b32.xlu0 %v1778_v18, %s1555_s23 }
  0x67   : > { %709 = vrot.lane.b32.xlu1 %v1877_v52, %s1555_s23 }
  0x68   : > { %608 = vrot.lane.b32.xlu0 %v1872_v50, %s1555_s23 }
  0x6b   : > { %775 = vrot.lane.b32.xlu1 %v1850_v43, %s1555_s23 }
  0x6c   : > { %706 = vrot.lane.b32.xlu0 %v1891_v57, %s1555_s23 }
  0x6f   : > { %841 = vrot.lane.b32.xlu1 %v1902_v60, %s1555_s23 }
  0x70   : > { %772 = vrot.lane.b32.xlu0 %v1847_v42, %s1555_s23 }
  0x74   : > { %838 = vrot.lane.b32.xlu0 %v1910_v61, %s1555_s23 }
  0xbd   : > { %v313_v62 = vpop.permute.xlu1 %312 }
  0xbe   : > { %v314_v6 = vsel %vm241_vm6, %v313_v62, %v1747_v3 }
  0xc1   : > { %v316_v2 = vpop.permute.xlu1 %315 }
  0xc2   : > { %v317_v10 = vsel %vm241_vm6, %v316_v2, %v1750_v4 }
  0xc6   : > { %v243_v63 = vpop.permute.xlu0 %242 }
  0xc7   : > { %v244_v5 = vsel %vm241_vm6, %v243_v63, %v1785_v20 }
  0xc8   : > { %248 = vrot.lane.b32.xlu0 %v244_v5, %s1555_s23 }
  0xc9   : > { %v382_v8 = vpop.permute.xlu1 %381 }
  0xca   : > { %v246_v7 = vpop.permute.xlu0 %245  ;;  %v383_v14 = vsel %vm241_vm6, %v382_v8, %v1813_v30 }
  0xcb   : > { %v247_v9 = vsel %vm241_vm6, %v246_v7, %v1804_v25 }
  0xcc   : > { %318 = vrot.lane.b32.xlu0 %v314_v6, %s1555_s23  ;;  %250 = vrot.lane.b32.xlu1 %v247_v9, %s1555_s23 }
  0xcd   : > { %v480_v13 = vpop.permute.xlu1 %479 }
  0xce   : > { %v379_v11 = vpop.permute.xlu0 %378  ;;  %v481_v21 = vsel %vm241_vm6, %v480_v13, %v1826_v33 }
  0xcf   : > { %v380_v12 = vsel %vm241_vm6, %v379_v11, %v1822_v32 }
  0xd0   : > { %320 = vrot.lane.b32.xlu1 %v317_v10, %s1555_s23  ;;  %384 = vrot.lane.b32.xlu0 %v380_v12, %s1555_s23 }
  0xd1   : > { %v546_v17 = vpop.permute.xlu1 %545 }
  0xd2   : > { %v477_v15 = vpop.permute.xlu0 %476  ;;  %v547_v26 = vsel %vm241_vm6, %v546_v17, %v1781_v19 }
  0xd3   : > { %v478_v16 = vsel %vm241_vm6, %v477_v15, %v1841_v39 }
  0xd4   : > { %386 = vrot.lane.b32.xlu1 %v383_v14, %s1555_s23  ;;  %482 = vrot.lane.b32.xlu0 %v478_v16, %s1555_s23 }
  0xd5   : > { %v612_v24 = vpop.permute.xlu1 %611 }
  0xd6   : > { %v543_v22 = vpop.permute.xlu0 %542  ;;  %v613_v29 = vsel %vm241_vm6, %v612_v24, %v1859_v45 }
  0xd7   : > { %v544_v23 = vsel %vm241_vm6, %v543_v22, %v1778_v18 }
  0xd8   : > { %484 = vrot.lane.b32.xlu1 %v481_v21, %s1555_s23  ;;  %548 = vrot.lane.b32.xlu0 %v544_v23, %s1555_s23 }
  0xd9   : > { %v710_v34 = vpop.permute.xlu1 %709 }
  0xda   : > { %v609_v27 = vpop.permute.xlu0 %608  ;;  %v711_v35 = vsel %vm241_vm6, %v710_v34, %v1877_v52 }
  0xdb   : > { %v610_v28 = vsel %vm241_vm6, %v609_v27, %v1872_v50 }
  0xdc   : > { %550 = vrot.lane.b32.xlu1 %v547_v26, %s1555_s23  ;;  %614 = vrot.lane.b32.xlu0 %v610_v28, %s1555_s23 }
  0xdd   : > { %v776_v37 = vpop.permute.xlu1 %775 }
  0xde   : > { %v707_v31 = vpop.permute.xlu0 %706  ;;  %v777_v41 = vsel %vm241_vm6, %v776_v37, %v1850_v43  ;;  %v2041_v37 = vand.u32 127, %v177_v0  ;;  %v2062_v0 = vmul.f32 -0.10662875, %v1747_v3 }
  0xdf   : > { %v708_v40 = vsel %vm241_vm6, %v707_v31, %v1891_v57 }
  0xe0   : > { %616 = vrot.lane.b32.xlu1 %v613_v29, %s1555_s23  ;;  %vm180_vm7 = vcmp.gt.s32.totalorder %v2041_v37, 0  ;;  %vm179_vm8 = vcmp.lt.s32.totalorder %v2041_v37, 31 }
  0xe1   : > { %v842_v46 = vpop.permute.xlu1 %841 }
  0xe2   : > { %v773_v36 = vpop.permute.xlu0 %772  ;;  %v843_v48 = vsel %vm241_vm6, %v842_v46, %v1902_v60  ;;  %v2056_v46 = vmul.f32 -0.111774705, %v1785_v20 }
  0xe3   : > { %v774_v38 = vsel %vm241_vm6, %v773_v36, %v1847_v42 }
  0xe4   : > { %714 = vrot.lane.b32.xlu1 %v711_v35, %s1555_s23  ;;  %778 = vrot.lane.b32.xlu0 %v774_v38, %s1555_s23  ;;  %v2044_v38 = vmul.f32 -0.045629025, %v1804_v25 }
  0xe6   : > { %v839_v44 = vpop.permute.xlu0 %838 }
  0xe7   : > { %v840_v47 = vsel %vm241_vm6, %v839_v44, %v1910_v61  ;;  %v2053_v44 = vmul.f32 -0.045629025, %v1785_v20 }
  0xe8   : > { %712 = vrot.lane.b32.xlu0 %v708_v40, %s1555_s23  ;;  %780 = vrot.lane.b32.xlu1 %v777_v41, %s1555_s23  ;;  %v2047_v40 = vmul.f32 -0.111774705, %v1804_v25  ;;  %v2050_v41 = vmul.f32 0.07722352, %v1804_v25 }
  0xec   : > { %844 = vrot.lane.b32.xlu0 %v840_v47, %s1555_s23  ;;  %846 = vrot.lane.b32.xlu1 %v843_v48, %s1555_s23  ;;  %v2059_v47 = vmul.f32 0.07722352, %v1785_v20  ;;  %v2065_v48 = vmul.f32 0.038251385, %v1747_v3 }
 0x13a   : > { %v249_v49 = vpop.permute.xlu0 %248 }
 0x13b   : > { %v252_v6 = vsel %vm241_vm6, %v249_v49, %v1785_v20  ;;  %v2068_v49 = vmul.f32 0.074740656, %v1747_v3  ;;  %v2080_v20 = vmul.f32 -0.007766455, %v1822_v32 }
 0x13e   : > { %v251_v51 = vpop.permute.xlu1 %250  ;;  %v319_v53 = vpop.permute.xlu0 %318 }
 0x13f   : > { %v322_v54 = vsel %vm241_vm6, %v319_v53, %v1747_v3  ;;  %v253_v63 = vsel %vm241_vm6, %v251_v51, %v1804_v25  ;;  %v2071_v25 = vmul.f32 -0.10662875, %v1750_v4  ;;  %v2074_v51 = vmul.f32 0.038251385, %v1750_v4 }
 0x140   : > { %326 = vrot.lane.b32.xlu0 %v322_v54, %s1556_s24  ;;  %v2077_v53 = vmul.f32 0.074740656, %v1750_v4  ;;  %v2087_v3 = vmul.f32 0.07425144, %v1822_v32 }
 0x142   : > { %v321_v55 = vpop.permute.xlu1 %320  ;;  %v385_v56 = vpop.permute.xlu0 %384 }
 0x143   : > { %v323_v58 = vsel %vm241_vm6, %v321_v55, %v1750_v4  ;;  %v388_v59 = vsel %vm241_vm6, %v385_v56, %v1822_v32  ;;  %v2090_v55 = vmul.f32 -0.007766455, %v1813_v30  ;;  %v2093_v56 = vmul.f32 0.05728742, %v1813_v30 }
 0x144   : > { %328 = vrot.lane.b32.xlu1 %v323_v58, %s1556_s24  ;;  %358 = vrot.lane.b32.xlu0 %v322_v54, %s1557_s8  ;;  %v2083_v54 = vmul.f32 0.05728742, %v1822_v32  ;;  %v2096_v4 = vmul.f32 0.07425144, %v1813_v30  ;;  %v2106_v32 = vmul.f32 0.08916323, %v1826_v33 }
 0x146   : > { %v387_v62 = vpop.permute.xlu1 %386  ;;  %v483_v2 = vpop.permute.xlu0 %482 }
 0x147   : > { %v389_v12 = vsel %vm241_vm6, %v387_v62, %v1813_v30  ;;  %v486_v13 = vsel %vm241_vm6, %v483_v2, %v1841_v39  ;;  %v2109_v62 = vmul.f32 0.032728184, %v1841_v39  ;;  %v2115_v30 = vmul.f32 0.08916323, %v1841_v39 }
 0x148   : > { %360 = vrot.lane.b32.xlu1 %v323_v58, %s1557_s8  ;;  %392 = vrot.lane.b32.xlu0 %v388_v59, %s1556_s24  ;;  %v2099_v58 = vmul.f32 0.032728184, %v1826_v33  ;;  %v2118_v2 = vmul.f32 -0.15521847, %v1781_v19 }
 0x14a   : > { %v485_v5 = vpop.permute.xlu1 %484  ;;  %v549_v8 = vpop.permute.xlu0 %548  ;;  %2615 = vst [vmem:[#allocation11_spill] sm:$0xff] %v2118_v2 }
 0x14b   : > { %v487_v7 = vsel %vm241_vm6, %v485_v5, %v1826_v33  ;;  %v552_v9 = vsel %vm241_vm6, %v549_v8, %v1778_v18  ;;  %v2121_v5 = vmul.f32 0.180961, %v1781_v19 }
 0x14c   : > { %260 = vrot.lane.b32.xlu1 %v253_v63, %s1556_s24  ;;  %424 = vrot.lane.b32.xlu0 %v388_v59, %s1557_s8  ;;  %v2102_v59 = vmul.f32 0.10767752, %v1826_v33  ;;  %v2127_v33 = vmul.f32 -0.15521847, %v1778_v18 }
 0x14d   : > { %2616 = vst [vmem:[#allocation12_spill] sm:$0xff] %v2121_v5 }
 0x14e   : > { %v551_v10 = vpop.permute.xlu1 %550  ;;  %v615_v15 = vpop.permute.xlu0 %614  ;;  %2618 = vst [vmem:[#allocation14_spill] sm:$0xff] %v2127_v33 }
 0x14f   : > { %v553_v11 = vsel %vm241_vm6, %v551_v10, %v1781_v19  ;;  %v618_v16 = vsel %vm241_vm6, %v615_v15, %v1872_v50  ;;  %v2139_v10 = vmul.f32 -0.07310412, %v1872_v50  ;;  %v2160_v15 = vmul.f32 -0.0027420544, %v1877_v52 }
 0x150   : > { %294 = vrot.lane.b32.xlu1 %v253_v63, %s1557_s8  ;;  %258 = vrot.lane.b32.xlu0 %v252_v6, %s1556_s24  ;;  %v2112_v63 = vmul.f32 0.10767752, %v1841_v39  ;;  %v2136_v39 = vmul.f32 0.10767871, %v1872_v50 }
 0x151   : > { %2622 = vst [vmem:[#allocation18_spill] sm:$0xff] %v2139_v10  ;;  %2629 = vst [vmem:[#allocation25_spill] sm:$0xff] %v2160_v15 }
 0x152   : > { %v617_v14 = vpop.permute.xlu1 %616  ;;  %2621 = vst [vmem:[#allocation17_spill] sm:$0xff] %v2136_v39 }
 0x153   : > { %v619_v24 = vsel %vm241_vm6, %v617_v14, %v1859_v45  ;;  %v2157_v14 = vmul.f32 -0.1636317, %v1877_v52 }
 0x154   : > { %492 = vrot.lane.b32.xlu1 %v487_v7, %s1556_s24  ;;  %292 = vrot.lane.b32.xlu0 %v252_v6, %s1557_s8  ;;  %v2124_v6 = vmul.f32 -0.07904473, %v1781_v19  ;;  %v2145_v19 = vmul.f32 0.10767871, %v1859_v45 }
 0x155   : > { %2628 = vst [vmem:[#allocation24_spill] sm:$0xff] %v2157_v14 }
 0x156   : > { %v715_v17 = vpop.permute.xlu1 %714  ;;  %v779_v22 = vpop.permute.xlu0 %778  ;;  %2617 = vst [vmem:[#allocation13_spill] sm:$0xff] %v2124_v6  ;;  %2624 = vst [vmem:[#allocation20_spill] sm:$0xff] %v2145_v19 }
 0x157   : > { %v717_v21 = vsel %vm241_vm6, %v715_v17, %v1877_v52  ;;  %v782_v23 = vsel %vm241_vm6, %v779_v22, %v1847_v42  ;;  %v2172_v22 = vmul.f32 -0.008792184, %v1847_v42 }
 0x158   : > { %524 = vrot.lane.b32.xlu1 %v487_v7, %s1557_s8  ;;  %556 = vrot.lane.b32.xlu0 %v552_v9, %s1556_s24  ;;  %v2130_v7 = vmul.f32 0.180961, %v1778_v18 }
 0x159   : > { %2633 = vst [vmem:[#allocation29_spill] sm:$0xff] %v2172_v22 }
 0x15a   : > { %v713_v26 = vpop.permute.xlu0 %712  ;;  %v781_v28 = vpop.permute.xlu1 %780  ;;  %2619 = vst [vmem:[#allocation15_spill] sm:$0xff] %v2130_v7 }
 0x15b   : > { %v716_v27 = vsel %vm241_vm6, %v713_v26, %v1891_v57  ;;  %v783_v29 = vsel %vm241_vm6, %v781_v28, %v1850_v43  ;;  %v2184_v26 = vmul.f32 -0.16761078, %v1850_v43  ;;  %v2192_v28 = vmul.f32 -0.04123878, %v1910_v61 }
 0x15c   : > { %558 = vrot.lane.b32.xlu1 %v553_v11, %s1556_s24  ;;  %588 = vrot.lane.b32.xlu0 %v552_v9, %s1557_s8  ;;  %v2133_v9 = vmul.f32 -0.07904473, %v1778_v18  ;;  %v2154_v18 = vmul.f32 -0.13427986, %v1877_v52  ;;  %v2178_v52 = vmul.f32 -0.17354271, %v1847_v42 }
 0x15d   : > { %2637 = vst [vmem:[#allocation33_spill] sm:$0xff] %v2184_v26  ;;  %2639 = vst [vmem:[#allocation35_spill] sm:$0xff] %v2192_v28 }
 0x15e   : > { %v845_v31 = vpop.permute.xlu0 %844  ;;  %v847_v35 = vpop.permute.xlu1 %846  ;;  %2620 = vst [vmem:[#allocation16_spill] sm:$0xff] %v2133_v9  ;;  %2627 = vst [vmem:[#allocation23_spill] sm:$0xff] %v2154_v18 }
 0x15f   : > { %v848_v34 = vsel %vm241_vm6, %v845_v31, %v1910_v61  ;;  %v849_v36 = vsel %vm241_vm6, %v847_v35, %v1902_v60  ;;  %2635 = vst [vmem:[#allocation31_spill] sm:$0xff] %v2178_v52  ;;  %v2200_v31 = vmul.f32 -0.080982395, %v1910_v61 }
 0x160   : > { %394 = vrot.lane.b32.xlu1 %v389_v12, %s1556_s24  ;;  %490 = vrot.lane.b32.xlu0 %v486_v13, %s1556_s24 }
 0x161   : > { %2641 = vst [vmem:[#allocation37_spill] sm:$0xff] %v2200_v31 }
 0x164   : > { %426 = vrot.lane.b32.xlu1 %v389_v12, %s1557_s8  ;;  %522 = vrot.lane.b32.xlu0 %v486_v13, %s1557_s8  ;;  %v2148_v12 = vmul.f32 -0.07310412, %v1859_v45  ;;  %v2151_v13 = vmul.f32 -0.10852508, %v1859_v45  ;;  %v2169_v45 = vmul.f32 -0.0027420544, %v1891_v57 }
 0x166   : > { %2625 = vst [vmem:[#allocation21_spill] sm:$0xff] %v2148_v12  ;;  %2626 = vst [vmem:[#allocation22_spill] sm:$0xff] %v2151_v13 }
 0x167   : > { %2632 = vst [vmem:[#allocation28_spill] sm:$0xff] %v2169_v45 }
 0x168   : > { %590 = vrot.lane.b32.xlu1 %v553_v11, %s1557_s8  ;;  %622 = vrot.lane.b32.xlu0 %v618_v16, %s1556_s24  ;;  %v2142_v11 = vmul.f32 -0.10852508, %v1872_v50  ;;  %v2163_v50 = vmul.f32 -0.13427986, %v1891_v57 }
 0x16a   : > { %2623 = vst [vmem:[#allocation19_spill] sm:$0xff] %v2142_v11  ;;  %2630 = vst [vmem:[#allocation26_spill] sm:$0xff] %v2163_v50 }
 0x16c   : > { %722 = vrot.lane.b32.xlu1 %v717_v21, %s1556_s24  ;;  %654 = vrot.lane.b32.xlu0 %v618_v16, %s1557_s8  ;;  %v2166_v16 = vmul.f32 -0.1636317, %v1891_v57  ;;  %v2189_v57 = vmul.f32 -0.17354271, %v1850_v43 }
 0x16e   : > { %2631 = vst [vmem:[#allocation27_spill] sm:$0xff] %v2166_v16  ;;  %2638 = vst [vmem:[#allocation34_spill] sm:$0xff] %v2189_v57 }
 0x170   : > { %624 = vrot.lane.b32.xlu1 %v619_v24, %s1556_s24  ;;  %786 = vrot.lane.b32.xlu0 %v782_v23, %s1556_s24 }
 0x174   : > { %656 = vrot.lane.b32.xlu1 %v619_v24, %s1557_s8  ;;  %720 = vrot.lane.b32.xlu0 %v716_v27, %s1556_s24  ;;  %v2181_v24 = vmul.f32 -0.008792184, %v1850_v43  ;;  %v2205_v43 = vmul.f32 -0.04123878, %v1902_v60 }
 0x176   : > { %2636 = vst [vmem:[#allocation32_spill] sm:$0xff] %v2181_v24  ;;  %2642 = vst [vmem:[#allocation38_spill] sm:$0xff] %v2205_v43 }
 0x178   : > { %754 = vrot.lane.b32.xlu1 %v717_v21, %s1557_s8  ;;  %752 = vrot.lane.b32.xlu0 %v716_v27, %s1557_s8 }
 0x17c   : > { %788 = vrot.lane.b32.xlu1 %v783_v29, %s1556_s24  ;;  %818 = vrot.lane.b32.xlu0 %v782_v23, %s1557_s8  ;;  %v2175_v23 = vmul.f32 -0.16761078, %v1847_v42  ;;  %v2197_v42 = vmul.f32 0.03141247, %v1910_v61 }
 0x17e   : > { %2634 = vst [vmem:[#allocation30_spill] sm:$0xff] %v2175_v23  ;;  %2640 = vst [vmem:[#allocation36_spill] sm:$0xff] %v2197_v42  ;;  %v2215_v42 = vmul.f32 -0.080982395, %v1902_v60 }
 0x180   : > { %820 = vrot.lane.b32.xlu1 %v783_v29, %s1557_s8  ;;  %852 = vrot.lane.b32.xlu0 %v848_v34, %s1556_s24  ;;  %2644 = vst [vmem:[#allocation40_spill] sm:$0xff] %v2215_v42 }
 0x184   : > { %854 = vrot.lane.b32.xlu1 %v849_v36, %s1556_s24  ;;  %884 = vrot.lane.b32.xlu0 %v848_v34, %s1557_s8 }
 0x188   : > { %886 = vrot.lane.b32.xlu1 %v849_v36, %s1557_s8 }
 0x1b2   : > { %v327_v8 = vpop.permute.xlu0 %326 }
 0x1b3   : > { %v332_v27 = vsel %vm180_vm7, %v327_v8, 0.0  ;;  %v2208_v8 = vmul.f32 0.03141247, %v1902_v60 }
 0x1b4   : > { %v2210_v1 = vmul.f32 -0.13245934, %v332_v27  ;;  %v2217_v61 = vmul.f32 0.09522717, %v332_v27 }
 0x1b5   : > { %2643 = vst [vmem:[#allocation39_spill] sm:$0xff] %v2208_v8 }
 0x1b6   : > { %v329_v17 = vpop.permute.xlu1 %328  ;;  %v359_v21 = vpop.permute.xlu0 %358 }
 0x1b7   : > { %v333_v29 = vsel %vm180_vm7, %v329_v17, 0.0  ;;  %v364_v34 = vsel %vm179_vm8, %v359_v21, 0.0  ;;  %v2212_v17 = vmul.f32 -0.025274932, %v332_v27 }
 0x1b8   : > { %v335_v31 = vmul.f32 -0.13245934, %v333_v29  ;;  %v339_v28 = vmul.f32 -0.025274932, %v333_v29  ;;  %v343_v57 = vmul.f32 0.09522717, %v333_v29 }
 0x1b9   : > { %v2221_v26 = vmul.f32 -0.05025997, %v364_v34  ;;  %v2223_v43 = vmul.f32 -0.06860344, %v364_v34  ;;  %v2225_v8 = vmul.f32 0.13330181, %v364_v34 }
 0x1ba   : > { %v361_v35 = vpop.permute.xlu1 %360  ;;  %v393_v36 = vpop.permute.xlu0 %392 }
 0x1bb   : > { %v365_v21 = vsel %vm179_vm8, %v361_v35, 0.0  ;;  %v398_v24 = vsel %vm180_vm7, %v393_v36, 0.0 }
 0x1bc   : > { %v2229_v42 = vmul.f32 -0.05025997, %v365_v21  ;;  %v2231_v27 = vmul.f32 -0.06860344, %v365_v21  ;;  %v2237_v34 = vmul.f32 0.13330181, %v365_v21 }
 0x1bd   : > { %v2239_v14 = vmul.f32 0.058060978, %v398_v24  ;;  %v2241_v36 = vmul.f32 0.09398982, %v398_v24  ;;  %v2243_v12 = vmul.f32 0.16086996, %v398_v24 }
 0x1be   : > { %v261_v52 = vpop.permute.xlu1 %260  ;;  %v425_v60 = vpop.permute.xlu0 %424 }
 0x1bf   : > { %v265_v35 = vsel %vm180_vm7, %v261_v52, 0.0  ;;  %v430_v29 = vsel %vm179_vm8, %v425_v60, 0.0 }
 0x1c0   : > { %v267_v23 = vmul.f32 0.048175108, %v265_v35  ;;  %v271_v22 = vmul.f32 0.01792588, %v265_v35  ;;  %v275_v15 = vmul.f32 -0.023715943, %v265_v35 }
 0x1c1   : > { %v2245_v52 = vmul.f32 -0.012779476, %v430_v29  ;;  %v2254_v24 = vmul.f32 0.01968029, %v430_v29 }
 0x1c2   : > { %v269_v45 = vadd.f32 0.08134657, %v267_v23  ;;  %v273_v16 = vadd.f32 0.00964296, %v271_v22  ;;  %v277_v18 = vadd.f32 0.18844679, %v275_v15  ;;  %v295_v50 = vpop.permute.xlu1 %294  ;;  %v259_v13 = vpop.permute.xlu0 %258 }
 0x1c3   : > { %v299_v60 = vsel %vm179_vm8, %v295_v50, 0.0  ;;  %v264_v21 = vsel %vm180_vm7, %v259_v13, 0.0 }
 0x1c4   : > { %v281_v35 = vadd.f32 %v2044_v38, %v269_v45  ;;  %v285_v19 = vadd.f32 %v2047_v40, %v273_v16  ;;  %v289_v23 = vadd.f32 %v2050_v41, %v277_v18  ;;  %v301_v22 = vmul.f32 -0.122920126, %v299_v60 }
 0x1c5   : > { %v305_v15 = vmul.f32 0.13390005, %v299_v60  ;;  %v309_v11 = vmul.f32 0.18364918, %v299_v60  ;;  %v266_v10 = vmul.f32 0.048175108, %v264_v21 }
 0x1c6   : > { %v303_v39 = vadd.f32 %v301_v22, %v281_v35  ;;  %v270_v6 = vmul.f32 0.01792588, %v264_v21  ;;  %v274_v5 = vmul.f32 -0.023715943, %v264_v21  ;;  %v493_v2 = vpop.permute.xlu1 %492  ;;  %v293_v50 = vpop.permute.xlu0 %292  ;;  %v2258_v40 = vmul.f32 -0.093792155, %v430_v29 }
 0x1c7   : > { %v307_v9 = vadd.f32 %v305_v15, %v285_v19  ;;  %v311_v7 = vadd.f32 %v309_v11, %v289_v23  ;;  %v268_v13 = vadd.f32 0.08134657, %v266_v10  ;;  %v497_v38 = vsel %vm180_vm7, %v493_v2, 0.0 }
 0x1c8   : > { %v337_v41 = vadd.f32 %v335_v31, %v303_v39  ;;  %v272_v18 = vadd.f32 0.00964296, %v270_v6  ;;  %v276_v16 = vadd.f32 0.18844679, %v274_v5  ;;  %v2261_v35 = vmul.f32 0.03284794, %v497_v38 }
 0x1c9   : > { %v341_v45 = vadd.f32 %v339_v28, %v307_v9  ;;  %v345_v60 = vadd.f32 %v343_v57, %v311_v7  ;;  %v280_v33 = vadd.f32 %v2053_v44, %v268_v13  ;;  %v2265_v11 = vmul.f32 -0.10919654, %v497_v38 }
 0x1ca   : > { %v284_v21 = vadd.f32 %v2056_v46, %v272_v18  ;;  %v288_v19 = vadd.f32 %v2059_v47, %v276_v16  ;;  %v298_v2 = vsel %vm179_vm8, %v293_v50, 0.0  ;;  %v525_v10 = vpop.permute.xlu1 %524  ;;  %v557_v29 = vpop.permute.xlu0 %556  ;;  %v349_v7 = vadd.f32 %v2071_v25, %v337_v41 }
 0x1cb   : > { %v300_v39 = vmul.f32 -0.122920126, %v298_v2  ;;  %v304_v6 = vmul.f32 0.13390005, %v298_v2  ;;  %v308_v5 = vmul.f32 0.18364918, %v298_v2  ;;  %v353_v47 = vadd.f32 %v2074_v51, %v341_v45 }
 0x1cc   : > { %v2270_v9 = vmul.f32 -0.034332737, %v497_v38  ;;  %v529_v44 = vsel %vm179_vm8, %v525_v10, 0.0  ;;  %v562_v46 = vsel %vm180_vm7, %v557_v29, 0.0  ;;  %v357_v38 = vadd.f32 %v2077_v53, %v345_v60 }
 0x1cd   : > { %v302_v57 = vadd.f32 %v300_v39, %v280_v33  ;;  %v306_v28 = vadd.f32 %v304_v6, %v284_v21  ;;  %v310_v31 = vadd.f32 %v308_v5, %v288_v19  ;;  %v2277_v23 = vmul.f32 0.050582256, %v529_v44 }
 0x1ce   : > { %v2279_v22 = vmul.f32 -0.15899639, %v529_v44  ;;  %v2281_v15 = vmul.f32 0.0940581, %v529_v44  ;;  %v2283_v25 = vmul.f32 -0.15014456, %v562_v46  ;;  %v559_v50 = vpop.permute.xlu1 %558  ;;  %v589_v13 = vpop.permute.xlu0 %588  ;;  %v369_v33 = vadd.f32 %v2229_v42, %v349_v7 }
 0x1cf   : > { %v336_v41 = vadd.f32 %v2210_v1, %v302_v57  ;;  %v340_v18 = vadd.f32 %v2212_v17, %v306_v28  ;;  %v344_v51 = vadd.f32 %v2217_v61, %v310_v31  ;;  %v2290_v16 = vmul.f32 0.18629195, %v562_v46 }
 0x1d0   : > { %v2292_v45 = vmul.f32 0.106635, %v562_v46  ;;  %v563_v21 = vsel %vm180_vm7, %v559_v50, 0.0  ;;  %v594_v19 = vsel %vm179_vm8, %v589_v13, 0.0  ;;  %v373_v29 = vadd.f32 %v2231_v27, %v353_v47 }
 0x1d1   : > { %v348_v53 = vadd.f32 %v2062_v0, %v336_v41  ;;  %v352_v1 = vadd.f32 %v2065_v48, %v340_v18  ;;  %v356_v17 = vadd.f32 %v2068_v49, %v344_v51  ;;  %v2301_v60 = vmul.f32 -0.15014456, %v563_v21 }
 0x1d2   : > { %v2303_v61 = vmul.f32 0.18629195, %v563_v21  ;;  %v2305_v42 = vmul.f32 0.106635, %v563_v21  ;;  %v2307_v2 = vmul.f32 -0.051163375, %v594_v19  ;;  %v395_v10 = vpop.permute.xlu1 %394  ;;  %v491_v39 = vpop.permute.xlu0 %490  ;;  %v377_v49 = vadd.f32 %v2237_v34, %v357_v38 }
 0x1d3   : > { %v368_v6 = vadd.f32 %v2221_v26, %v348_v53  ;;  %v372_v0 = vadd.f32 %v2223_v43, %v352_v1  ;;  %v376_v48 = vadd.f32 %v2225_v8, %v356_v17  ;;  %v2314_v5 = vmul.f32 0.080567196, %v594_v19 }
 0x1d4   : > { %v2316_v7 = vmul.f32 0.13460031, %v594_v19  ;;  %v399_v44 = vsel %vm180_vm7, %v395_v10, 0.0  ;;  %v496_v46 = vsel %vm180_vm7, %v491_v39, 0.0 }
 0x1d5   : > { %v401_v27 = vmul.f32 0.058060978, %v399_v44  ;;  %v405_v47 = vmul.f32 0.09398982, %v399_v44  ;;  %v409_v57 = vmul.f32 0.16086996, %v399_v44  ;;  %v402_v26 = vadd.f32 %v2239_v14, %v368_v6 }
 0x1d6   : > { %v406_v43 = vadd.f32 %v2241_v36, %v372_v0  ;;  %v410_v8 = vadd.f32 %v2243_v12, %v376_v48  ;;  %v498_v34 = vmul.f32 0.03284794, %v496_v46  ;;  %v502_v28 = vmul.f32 -0.10919654, %v496_v46  ;;  %v427_v31 = vpop.permute.xlu1 %426  ;;  %v523_v50 = vpop.permute.xlu0 %522 }
 0x1d7   : > { %v403_v13 = vadd.f32 %v401_v27, %v369_v33  ;;  %v407_v38 = vadd.f32 %v405_v47, %v373_v29  ;;  %v411_v41 = vadd.f32 %v409_v57, %v377_v49  ;;  %v414_v18 = vadd.f32 %v2080_v20, %v402_v26 }
 0x1d8   : > { %v418_v51 = vadd.f32 %v2083_v54, %v406_v43  ;;  %v422_v21 = vadd.f32 %v2087_v3, %v410_v8  ;;  %v506_v19 = vmul.f32 -0.034332737, %v496_v46  ;;  %v431_v14 = vsel %vm179_vm8, %v427_v31, 0.0 }
 0x1d9   : > { %v434_v36 = vadd.f32 %v2245_v52, %v414_v18  ;;  %v415_v12 = vadd.f32 %v2090_v55, %v403_v13  ;;  %v419_v53 = vadd.f32 %v2093_v56, %v407_v38  ;;  %v423_v33 = vadd.f32 %v2096_v4, %v411_v41 }
 0x1da   : > { %v438_v1 = vadd.f32 %v2254_v24, %v418_v51  ;;  %v442_v20 = vadd.f32 %v2258_v40, %v422_v21  ;;  %v433_v17 = vmul.f32 -0.012779476, %v431_v14  ;;  %v437_v54 = vmul.f32 0.01968029, %v431_v14  ;;  %v591_v10 = vpop.permute.xlu1 %590  ;;  %v623_v3 = vpop.permute.xlu0 %622 }
 0x1db   : > { %v500_v29 = vadd.f32 %v498_v34, %v434_v36  ;;  %v441_v39 = vmul.f32 -0.093792155, %v431_v14  ;;  %v528_v6 = vsel %vm179_vm8, %v523_v50, 0.0  ;;  %v595_v55 = vsel %vm179_vm8, %v591_v10, 0.0  ;;  %v2646_v36 = vld [vmem:[#allocation15_spill] sm:$0xff] }
 0x1dc   : > { %v504_v52 = vadd.f32 %v502_v28, %v438_v1  ;;  %v508_v56 = vadd.f32 %v506_v19, %v442_v20  ;;  %v435_v0 = vadd.f32 %v433_v17, %v415_v12  ;;  %v439_v4 = vadd.f32 %v437_v54, %v419_v53  ;;  %v2647_v53 = vld [vmem:[#allocation16_spill] sm:$0xff] }
 0x1dd   : > { %v443_v48 = vadd.f32 %v441_v39, %v423_v33  ;;  %v512_v24 = vadd.f32 %v2109_v62, %v500_v29  ;;  %v530_v40 = vmul.f32 0.050582256, %v528_v6  ;;  %v534_v49 = vmul.f32 -0.15899639, %v528_v6  ;;  %v2650_v29 = vld [vmem:[#allocation13_spill] sm:$0xff] }
 0x1de   : > { %v501_v44 = vadd.f32 %v2261_v35, %v435_v0  ;;  %v505_v46 = vadd.f32 %v2265_v11, %v439_v4  ;;  %v516_v27 = vadd.f32 %v2112_v63, %v504_v52  ;;  %v520_v47 = vadd.f32 %v2115_v30, %v508_v56  ;;  %v723_v57 = vpop.permute.xlu1 %722  ;;  %v655_v26 = vpop.permute.xlu0 %654 }
 0x1df   : > { %v509_v43 = vadd.f32 %v2270_v9, %v443_v48  ;;  %v532_v8 = vadd.f32 %v530_v40, %v512_v24  ;;  %v538_v34 = vmul.f32 0.0940581, %v528_v6  ;;  %v597_v28 = vmul.f32 -0.051163375, %v595_v55  ;;  %v2651_v40 = vld [vmem:[#allocation17_spill] sm:$0xff] }
 0x1e0   : > { %v513_v31 = vadd.f32 %v2099_v58, %v501_v44  ;;  %v517_v62 = vadd.f32 %v2102_v59, %v505_v46  ;;  %v536_v50 = vadd.f32 %v534_v49, %v516_v27  ;;  %v601_v13 = vmul.f32 0.080567196, %v595_v55  ;;  %v2652_v49 = vld [vmem:[#allocation18_spill] sm:$0xff] }
 0x1e1   : > { %v521_v35 = vadd.f32 %v2106_v32, %v509_v43  ;;  %v540_v11 = vadd.f32 %v538_v34, %v520_v47  ;;  %v566_v63 = vadd.f32 %v2283_v25, %v532_v8  ;;  %v605_v38 = vmul.f32 0.13460031, %v595_v55  ;;  %v2645_v32 = vld [vmem:[#allocation14_spill] sm:$0xff]  ;;  %v2653_v47 = vld [vmem:[#allocation19_spill] sm:$0xff] }
 0x1e2   : > { %v570_v30 = vadd.f32 %v2290_v16, %v536_v50  ;;  %v533_v41 = vadd.f32 %v2277_v23, %v513_v31  ;;  %v537_v9 = vadd.f32 %v2279_v22, %v517_v62  ;;  %v628_v18 = vsel %vm180_vm7, %v623_v3, 0.0  ;;  %v625_v58 = vpop.permute.xlu1 %624  ;;  %v787_v51 = vpop.permute.xlu0 %786 }
 0x1e3   : > { %v574_v59 = vadd.f32 %v2292_v45, %v540_v11  ;;  %v541_v21 = vadd.f32 %v2281_v15, %v521_v35  ;;  %v578_v19 = vadd.f32 %v2645_v32, %v566_v63  ;;  %v630_v14 = vmul.f32 -0.032749154, %v628_v18  ;;  %v2648_v45 = vld [vmem:[#allocation11_spill] sm:$0xff]  ;;  %v2649_v15 = vld [vmem:[#allocation12_spill] sm:$0xff] }
 0x1e4   : > { %v567_v25 = vadd.f32 %v2301_v60, %v533_v41  ;;  %v571_v16 = vadd.f32 %v2303_v61, %v537_v9  ;;  %v582_v23 = vadd.f32 %v2646_v36, %v570_v30  ;;  %v634_v12 = vmul.f32 0.18376707, %v628_v18 }
 0x1e5   : > { %v575_v22 = vadd.f32 %v2305_v42, %v541_v21  ;;  %v586_v33 = vadd.f32 %v2647_v53, %v574_v59  ;;  %v598_v1 = vadd.f32 %v2307_v2, %v578_v19  ;;  %v638_v20 = vmul.f32 0.10353624, %v628_v18  ;;  %v2654_v21 = vld [vmem:[#allocation20_spill] sm:$0xff]  ;;  %v2655_v19 = vld [vmem:[#allocation21_spill] sm:$0xff] }
 0x1e6   : > { %v579_v17 = vadd.f32 %v2648_v45, %v567_v25  ;;  %v583_v54 = vadd.f32 %v2649_v15, %v571_v16  ;;  %v602_v10 = vadd.f32 %v2314_v5, %v582_v23  ;;  %v727_v60 = vsel %vm180_vm7, %v723_v57, 0.0  ;;  %v657_v61 = vpop.permute.xlu1 %656  ;;  %v721_v3 = vpop.permute.xlu0 %720  ;;  %v2656_v25 = vld [vmem:[#allocation22_spill] sm:$0xff] }
 0x1e7   : > { %v587_v39 = vadd.f32 %v2650_v29, %v575_v22  ;;  %v606_v42 = vadd.f32 %v2316_v7, %v586_v33  ;;  %v632_v6 = vadd.f32 %v630_v14, %v598_v1  ;;  %v729_v55 = vmul.f32 -0.017175408, %v727_v60 }
 0x1e8   : > { %v599_v52 = vadd.f32 %v597_v28, %v579_v17  ;;  %v603_v2 = vadd.f32 %v601_v13, %v583_v54  ;;  %v636_v56 = vadd.f32 %v634_v12, %v602_v10  ;;  %v733_v0 = vmul.f32 0.10760067, %v727_v60 }
 0x1e9   : > { %v607_v4 = vadd.f32 %v605_v38, %v587_v39  ;;  %v640_v48 = vadd.f32 %v638_v20, %v606_v42  ;;  %v737_v24 = vmul.f32 -0.16498494, %v727_v60  ;;  %v644_v5 = vadd.f32 %v2651_v40, %v632_v6  ;;  %v2659_v40 = vld [vmem:[#allocation27_spill] sm:$0xff] }
 0x1ea   : > { %v648_v44 = vadd.f32 %v2652_v49, %v636_v56  ;;  %v660_v46 = vsel %vm179_vm8, %v655_v26, 0.0  ;;  %v629_v27 = vsel %vm180_vm7, %v625_v58, 0.0  ;;  %v792_v7 = vsel %vm180_vm7, %v787_v51, 0.0  ;;  %v755_v28 = vpop.permute.xlu1 %754  ;;  %v753_v31 = vpop.permute.xlu0 %752  ;;  %v2660_v49 = vld [vmem:[#allocation28_spill] sm:$0xff] }
 0x1eb   : > { %v652_v57 = vadd.f32 %v2653_v47, %v640_v48  ;;  %v662_v43 = vmul.f32 0.03281582, %v660_v46  ;;  %v666_v8 = vmul.f32 0.08073609, %v660_v46  ;;  %v670_v34 = vmul.f32 -0.02187697, %v660_v46 }
 0x1ec   : > { %v631_v62 = vmul.f32 -0.032749154, %v629_v27  ;;  %v635_v50 = vmul.f32 0.18376707, %v629_v27  ;;  %v639_v13 = vmul.f32 0.10353624, %v629_v27 }
 0x1ed   : > { %v664_v35 = vadd.f32 %v662_v43, %v644_v5  ;;  %v668_v11 = vadd.f32 %v666_v8, %v648_v44  ;;  %v672_v63 = vadd.f32 %v670_v34, %v652_v57  ;;  %v794_v26 = vmul.f32 0.0330301, %v792_v7  ;;  %v2661_v27 = vld [vmem:[#allocation24_spill] sm:$0xff] }
 0x1ee   : > { %v633_v38 = vadd.f32 %v631_v62, %v599_v52  ;;  %v637_v30 = vadd.f32 %v635_v50, %v603_v2  ;;  %v641_v41 = vadd.f32 %v639_v13, %v607_v4  ;;  %v798_v9 = vmul.f32 0.05920077, %v792_v7  ;;  %v789_v53 = vpop.permute.xlu1 %788  ;;  %v819_v33 = vpop.permute.xlu0 %818  ;;  %v2657_v52 = vld [vmem:[#allocation26_spill] sm:$0xff]  ;;  %v2658_v4 = vld [vmem:[#allocation23_spill] sm:$0xff] }
 0x1ef   : > { %v802_v18 = vmul.f32 0.01903613, %v792_v7  ;;  %v661_v58 = vsel %vm179_vm8, %v657_v61, 0.0  ;;  %v726_v51 = vsel %vm180_vm7, %v721_v3, 0.0  ;;  %v759_v59 = vsel %vm179_vm8, %v755_v28, 0.0 }
 0x1f0   : > { %v645_v32 = vadd.f32 %v2654_v21, %v633_v38  ;;  %v649_v14 = vadd.f32 %v2655_v19, %v637_v30  ;;  %v653_v16 = vadd.f32 %v2656_v25, %v641_v41  ;;  %v663_v36 = vmul.f32 0.03281582, %v661_v58 }
 0x1f1   : > { %v667_v23 = vmul.f32 0.08073609, %v661_v58  ;;  %v671_v12 = vmul.f32 -0.02187697, %v661_v58  ;;  %v728_v22 = vmul.f32 -0.017175408, %v726_v51 }
 0x1f2   : > { %v665_v1 = vadd.f32 %v663_v36, %v645_v32  ;;  %v732_v20 = vmul.f32 0.10760067, %v726_v51  ;;  %v736_v45 = vmul.f32 -0.16498494, %v726_v51  ;;  %v761_v17 = vmul.f32 0.009355728, %v759_v59 }
 0x1f3   : > { %v669_v15 = vadd.f32 %v667_v23, %v649_v14  ;;  %v673_v54 = vadd.f32 %v671_v12, %v653_v16  ;;  %v730_v10 = vadd.f32 %v728_v22, %v664_v35  ;;  %v765_v60 = vmul.f32 0.10263164, %v759_v59  ;;  %v2663_v14 = vld [vmem:[#allocation29_spill] sm:$0xff]  ;;  %v2664_v16 = vld [vmem:[#allocation30_spill] sm:$0xff]  ;;  %v2665_v23 = vld [vmem:[#allocation31_spill] sm:$0xff] }
 0x1f4   : > { %v731_v61 = vadd.f32 %v729_v55, %v665_v1  ;;  %v734_v3 = vadd.f32 %v732_v20, %v668_v11  ;;  %v738_v29 = vadd.f32 %v736_v45, %v672_v63  ;;  %v769_v39 = vmul.f32 -0.043691035, %v759_v59  ;;  %v2662_v55 = vld [vmem:[#allocation25_spill] sm:$0xff] }
 0x1f5   : > { %v735_v42 = vadd.f32 %v733_v0, %v669_v15  ;;  %v739_v6 = vadd.f32 %v737_v24, %v673_v54  ;;  %v742_v2 = vadd.f32 %v2657_v52, %v730_v10  ;;  %v758_v56 = vsel %vm179_vm8, %v753_v31, 0.0  ;;  %v821_v0 = vpop.permute.xlu1 %820  ;;  %v853_v24 = vpop.permute.xlu0 %852  ;;  %v2667_v20 = vld [vmem:[#allocation33_spill] sm:$0xff] }
 0x1f6   : > { %v743_v48 = vadd.f32 %v2658_v4, %v731_v61  ;;  %v746_v5 = vadd.f32 %v2659_v40, %v734_v3  ;;  %v750_v44 = vadd.f32 %v2660_v49, %v738_v29  ;;  %v760_v46 = vmul.f32 0.009355728, %v758_v56 }
 0x1f7   : > { %v747_v7 = vadd.f32 %v2661_v27, %v735_v42  ;;  %v751_v47 = vadd.f32 %v2662_v55, %v739_v6  ;;  %v764_v57 = vmul.f32 0.10263164, %v758_v56  ;;  %v768_v43 = vmul.f32 -0.043691035, %v758_v56 }
 0x1f8   : > { %v763_v8 = vadd.f32 %v761_v17, %v743_v48  ;;  %v762_v34 = vadd.f32 %v760_v46, %v742_v2  ;;  %v793_v28 = vsel %vm180_vm7, %v789_v53, 0.0  ;;  %v824_v31 = vsel %vm179_vm8, %v819_v33, 0.0  ;;  %v2668_v17 = vld [vmem:[#allocation34_spill] sm:$0xff] }
 0x1f9   : > { %v767_v62 = vadd.f32 %v765_v60, %v747_v7  ;;  %v771_v50 = vadd.f32 %v769_v39, %v751_v47  ;;  %v766_v13 = vadd.f32 %v764_v57, %v746_v5  ;;  %v770_v35 = vadd.f32 %v768_v43, %v750_v44  ;;  %v855_v53 = vpop.permute.xlu1 %854  ;;  %v885_v33 = vpop.permute.xlu0 %884 }
 0x1fa   : > { %v796_v11 = vadd.f32 %v794_v26, %v762_v34  ;;  %v795_v63 = vmul.f32 0.0330301, %v793_v28  ;;  %v799_v38 = vmul.f32 0.05920077, %v793_v28  ;;  %v803_v30 = vmul.f32 0.01903613, %v793_v28 }
 0x1fb   : > { %v800_v41 = vadd.f32 %v798_v9, %v766_v13  ;;  %v804_v58 = vadd.f32 %v802_v18, %v770_v35  ;;  %v826_v51 = vmul.f32 0.041558545, %v824_v31  ;;  %v830_v59 = vmul.f32 0.12439051, %v824_v31  ;;  %v2666_v9 = vld [vmem:[#allocation32_spill] sm:$0xff] }
 0x1fc   : > { %v797_v21 = vadd.f32 %v795_v63, %v763_v8  ;;  %v801_v32 = vadd.f32 %v799_v38, %v767_v62  ;;  %v805_v19 = vadd.f32 %v803_v30, %v771_v50  ;;  %v808_v25 = vadd.f32 %v2663_v14, %v796_v11  ;;  %v2670_v34 = vld [vmem:[#allocation36_spill] sm:$0xff]  ;;  %v2672_v50 = vld [vmem:[#allocation39_spill] sm:$0xff] }
 0x1fd   : > { %v812_v36 = vadd.f32 %v2664_v16, %v800_v41  ;;  %v816_v12 = vadd.f32 %v2665_v23, %v804_v58  ;;  %v834_v22 = vmul.f32 0.023757514, %v824_v31  ;;  %v825_v26 = vsel %vm179_vm8, %v821_v0, 0.0  ;;  %v887_v7 = vpop.permute.xlu1 %886  ;;  %v2671_v31 = vld [vmem:[#allocation38_spill] sm:$0xff]  ;;  %v2673_v38 = vld [vmem:[#allocation40_spill] sm:$0xff]  ;;  %v2674_v58 = vld [vmem:[#allocation37_spill] sm:$0xff] }
 0x1fe   : > { %v828_v1 = vadd.f32 %v826_v51, %v808_v25  ;;  %v809_v18 = vadd.f32 %v2666_v9, %v797_v21  ;;  %v813_v45 = vadd.f32 %v2667_v20, %v801_v32  ;;  %v817_v15 = vadd.f32 %v2668_v17, %v805_v19 }
 0x1ff   : > { %v832_v54 = vadd.f32 %v830_v59, %v812_v36  ;;  %v836_v10 = vadd.f32 %v834_v22, %v816_v12  ;;  %v827_v60 = vmul.f32 0.041558545, %v825_v26  ;;  %v831_v61 = vmul.f32 0.12439051, %v825_v26 }
 0x200   : > { %v835_v3 = vmul.f32 0.023757514, %v825_v26  ;;  %v858_v29 = vsel %vm180_vm7, %v853_v24, 0.0  ;;  %v859_v39 = vsel %vm180_vm7, %v855_v53, 0.0  ;;  %v890_v42 = vsel %vm179_vm8, %v885_v33, 0.0  ;;  %v2669_v24 = vld [vmem:[#allocation35_spill] sm:$0xff] }
 0x201   : > { %v829_v6 = vadd.f32 %v827_v60, %v809_v18  ;;  %v833_v52 = vadd.f32 %v831_v61, %v813_v45  ;;  %v860_v2 = vmul.f32 0.009831541, %v858_v29  ;;  %v864_v56 = vmul.f32 0.022869296, %v858_v29 }
 0x202   : > { %v837_v4 = vadd.f32 %v835_v3, %v817_v15  ;;  %v868_v48 = vmul.f32 0.016468432, %v858_v29  ;;  %v861_v40 = vmul.f32 0.009831541, %v859_v39  ;;  %v865_v5 = vmul.f32 0.022869296, %v859_v39 }
 0x203   : > { %v862_v49 = vadd.f32 %v860_v2, %v828_v1  ;;  %v866_v44 = vadd.f32 %v864_v56, %v832_v54  ;;  %v869_v46 = vmul.f32 0.016468432, %v859_v39  ;;  %v892_v27 = vmul.f32 0.09143213, %v890_v42 }
 0x204   : > { %v870_v55 = vadd.f32 %v868_v48, %v836_v10  ;;  %v863_v47 = vadd.f32 %v861_v40, %v829_v6  ;;  %v867_v57 = vadd.f32 %v865_v5, %v833_v52  ;;  %v896_v43 = vmul.f32 0.10514658, %v890_v42 }
 0x205   : > { %v871_v0 = vadd.f32 %v869_v46, %v837_v4  ;;  %v874_v8 = vadd.f32 %v2669_v24, %v862_v49  ;;  %v878_v28 = vadd.f32 %v2670_v34, %v866_v44  ;;  %v891_v35 = vsel %vm179_vm8, %v887_v7, 0.0  ;;  %v1008_v24 = vld [vmem:[%s2597_s1 + $0x10] sm:$0xff] }
 0x206   : > { %v875_v62 = vadd.f32 %v2671_v31, %v863_v47  ;;  %v879_v13 = vadd.f32 %v2672_v50, %v867_v57  ;;  %v900_v63 = vmul.f32 -0.105439775, %v890_v42  ;;  %v893_v41 = vmul.f32 0.09143213, %v891_v35  ;;  %v1006_v47 = vld [vmem:[%s2597_s1] sm:$0xff]  ;;  %v1007_v57 = vld [vmem:[%s2597_s1 + $0x8] sm:$0xff] }
 0x207   : > { %v898_v11 = vadd.f32 %v896_v43, %v878_v28  ;;  %v883_v30 = vadd.f32 %v2673_v38, %v871_v0  ;;  %v882_v51 = vadd.f32 %v2674_v58, %v870_v55  ;;  %v894_v59 = vadd.f32 %v892_v27, %v874_v8  ;;  %v1009_v8 = vld [vmem:[%s2597_s1 + $0x18] sm:$0xff] }
 0x208   : > { %v897_v21 = vmul.f32 0.10514658, %v891_v35  ;;  %v901_v32 = vmul.f32 -0.105439775, %v891_v35  ;;  %v895_v19 = vadd.f32 %v893_v41, %v875_v62  ;;  %v1558_v43 = vmov 0.0|0.0  }
 0x209   : > { %v937_v14 = vmax.f32 %v898_v11, 0.0  ;;  %v902_v23 = vadd.f32 %v900_v63, %v882_v51  ;;  %v904_v12 = vmax.f32 %v894_v59, 0.0  ;;  %1276 = vmatprep.subr.bf16.mxu1 %v1558_v43  ;;  %v1271_v0 = vpack.c.bf16 %v1007_v57, %v1006_v47  ;;  %1270 = vmatprep.subr.bf16.mxu0 %v1558_v43 }
 0x20a   : > { %v899_v25 = vadd.f32 %v897_v21, %v879_v13  ;;  %v903_v16 = vadd.f32 %v901_v32, %v883_v30  ;;  %v905_v36 = vmax.f32 %v895_v19, 0.0  ;;  %v1274_v34 = vpack.c.bf16 %v1009_v8, %v1008_v24 }
 0x20b   : > { %v939_v37 = vrot.slane %v937_v14, 1  ;;  %v906_v1 = vrot.slane %v904_v12, 1  ;;  %v969_v9 = vmax.f32 %v902_v23, 0.0  ;;  %1278 = vmatpush3.bf16.msra.mxu1 %v1271_v0  ;;  %1272 = vmatpush3.bf16.msra.mxu0 %v1271_v0  ;;  %v1560_v62 = vmov 0.0  }
 0x20c   : > { %v938_v22 = vmax.f32 %v899_v25, 0.0  ;;  %v907_v26 = vrot.slane %v905_v36, 1  ;;  %v970_v33 = vmax.f32 %v903_v16, 0.0  ;;  %1277 = vmatprep.subr.bf16.mxu1 %v1558_v43  ;;  %1273 = vmatprep.subr.bf16.mxu0 %v1558_v43 }
 0x20d   : > { %v971_v61 = vrot.slane %v969_v9, 1  ;;  %1264 = vmatprep.mubr.msk.f32.mxu1 %vm1559_vm9, %v1560_v62  ;;  %1261 = vmatprep.mubr.msk.f32.mxu0 %vm1559_vm9, %v1560_v62 }
 0x20e   : > { %v940_v53 = vrot.slane %v938_v22, 1  ;;  %v909_v54 = vsel %vm228_vm3, %v907_v26, %v906_v1  ;;  %v972_v10 = vrot.slane %v970_v33, 1  ;;  %v908_v60 = vsel %vm228_vm3, %v906_v1, %v907_v26 }
 0x20f   : > { %v2439_v3 = vmax.f32 %v905_v36, %v909_v54  ;;  %v2441_v29 = vmax.f32 %v904_v12, %v908_v60  ;;  %1279 = vmatpush3.bf16.msra.mxu1 %v1274_v34  ;;  %1275 = vmatpush3.bf16.msra.mxu0 %v1274_v34 }
 0x210   : > { %v942_v20 = vsel %vm228_vm3, %v940_v53, %v939_v37  ;;  %v941_v45 = vsel %vm228_vm3, %v939_v37, %v940_v53  ;;  %v974_v39 = vsel %vm228_vm3, %v972_v10, %v971_v61  ;;  %v973_v42 = vsel %vm228_vm3, %v971_v61, %v972_v10 }
 0x211   : > { %v2427_v17 = vmax.f32 %v938_v22, %v942_v20  ;;  %v2429_v15 = vmax.f32 %v937_v14, %v941_v45  ;;  %v2451_v6 = vmax.f32 %v970_v33, %v974_v39  ;;  %v2453_v52 = vmax.f32 %v969_v9, %v973_v42 }
 0x213   : > { %948 = vrot.lane.b32.xlu1 %v2427_v17, %s1555_s23  ;;  %945 = vrot.lane.b32.xlu0 %v2429_v15, %s1555_s23 }
 0x217   : > { %915 = vrot.lane.b32.xlu1 %v2439_v3, %s1555_s23  ;;  %912 = vrot.lane.b32.xlu0 %v2441_v29, %s1555_s23 }
 0x21b   : > { %980 = vrot.lane.b32.xlu1 %v2451_v6, %s1555_s23  ;;  %977 = vrot.lane.b32.xlu0 %v2453_v52, %s1555_s23 }
 0x285   : > { %v949_v2 = vpop.permute.xlu1 %948  ;;  %v946_v56 = vpop.permute.xlu0 %945 }
 0x286   : > { %v950_v4 = vsel %vm241_vm6, %v949_v2, %v2427_v17  ;;  %v947_v48 = vsel %vm241_vm6, %v946_v56, %v2429_v15 }
 0x287   : > { %953 = vrot.lane.b32.xlu1 %v950_v4, %s1555_s23  ;;  %951 = vrot.lane.b32.xlu0 %v947_v48, %s1555_s23 }
 0x289   : > { %v916_v40 = vpop.permute.xlu1 %915  ;;  %v913_v5 = vpop.permute.xlu0 %912 }
 0x28a   : > { %v917_v49 = vsel %vm241_vm6, %v916_v40, %v2439_v3  ;;  %v914_v44 = vsel %vm241_vm6, %v913_v5, %v2441_v29 }
 0x28b   : > { %920 = vrot.lane.b32.xlu1 %v917_v49, %s1555_s23  ;;  %918 = vrot.lane.b32.xlu0 %v914_v44, %s1555_s23 }
 0x28d   : > { %v981_v46 = vpop.permute.xlu1 %980  ;;  %v978_v27 = vpop.permute.xlu0 %977 }
 0x28e   : > { %v982_v7 = vsel %vm241_vm6, %v981_v46, %v2451_v6  ;;  %v979_v55 = vsel %vm241_vm6, %v978_v27, %v2453_v52 }
 0x28f   : > { %985 = vrot.lane.b32.xlu1 %v982_v7, %s1555_s23  ;;  %983 = vrot.lane.b32.xlu0 %v979_v55, %s1555_s23  ;;  %s173_s23 = sand.u32 1, %s1514_s10  }
 0x290   : > { %s1283_s30 = smul.u32 24, %s173_s23  ;;  %s2535_s29 = scalar_lea.sflag [#allocation5], %s173_s23 }
 0x292   : > { %s175_s24 = scalar_lea.vmem [#allocation6], %s1283_s30 }
 0x293   : > { %s1118_s7 = sshll.u32 %s175_s24, 4  ;;  %s2528_s7 = int_to_ptr.vmem [resolvable:$true] %s1118_s7 }
 0x294   : > { %p1435_p10 = scmp.lt.s32.totalorder %s2528_s7, %s1433_s12 }
 0x2f9   : > { %v954_v28 = vpop.permute.xlu1 %953  ;;  %v952_v31 = vpop.permute.xlu0 %951 }
 0x2fa   : > { %v956_v50 = vsel %vm241_vm6, %v954_v28, %v2427_v17  ;;  %v955_v13 = vsel %vm241_vm6, %v952_v31, %v2429_v15 }
 0x2fb   : > { %961 = vrot.lane.b32.xlu1 %v956_v50, %s1557_s8  ;;  %959 = vrot.lane.b32.xlu0 %v955_v13, %s1557_s8 }
 0x2fd   : > { %v921_v35 = vpop.permute.xlu1 %920  ;;  %v919_v11 = vpop.permute.xlu0 %918 }
 0x2fe   : > { %v923_v63 = vsel %vm241_vm6, %v921_v35, %v2439_v3  ;;  %v922_v38 = vsel %vm241_vm6, %v919_v11, %v2441_v29 }
 0x2ff   : > { %928 = vrot.lane.b32.xlu1 %v923_v63, %s1557_s8  ;;  %926 = vrot.lane.b32.xlu0 %v922_v38, %s1557_s8 }
 0x301   : > { %v986_v30 = vpop.permute.xlu1 %985  ;;  %v984_v41 = vpop.permute.xlu0 %983 }
 0x302   : > { %v988_v58 = vsel %vm241_vm6, %v986_v30, %v2451_v6  ;;  %v987_v51 = vsel %vm241_vm6, %v984_v41, %v2453_v52 }
 0x303   : > { %993 = vrot.lane.b32.xlu1 %v988_v58, %s1557_s8  ;;  %991 = vrot.lane.b32.xlu0 %v987_v51, %s1557_s8  ;;  %s1115_s8 = sadd.s32 %s1534_s15, %s1284_s26  ;;  %s1428_s15 = scalar_lea.vmem %s2528_s7, 384 }
 0x304   : > { %s1243_s21 = sshll.u32 %s1115_s8, 7  ;;  %p1429_p0 = scmp.ne.s32.totalorder %s2528_s7, %s1428_s15 }
 0x305   : > { %s2533_s16 = scalar_lea.hbm %s2598_s2, %s1243_s21  ;;  %p1436_p11 = scmp.lt.s32.totalorder %s1434_s28, %s1428_s15 }
 0x306   : > { %p1430_p3 = pnand %p1429_p0, %p2676_p1 }
 0x307   : > { %p1437_p13 = por %p1436_p11, %p1435_p10 }
 0x308   : > { %p1431_p8 = pneg %p1430_p3 }
 0x30a   : > { %p1438_p5 = pnand %p1437_p13, %p1431_p8 }
 0x36d   : > { %v962_v59 = vpop.permute.xlu1 %961  ;;  %v960_v21 = vpop.permute.xlu0 %959 }
 0x36e   : > { %v966_v32 = vmax.f32 %v2427_v17, %v962_v59  ;;  %v965_v19 = vmax.f32 %v2429_v15, %v960_v21 }
 0x370   : > { %968 = vst.msk [vmem:[#allocation2 + $0x18] sm:$0xff] %vm934_vm10, %v966_v32  ;;  %967 = vst.msk [vmem:[#allocation2 + $0x10] sm:$0xff] %vm934_vm10, %v965_v19 }
 0x371   : > { %v929_v14 = vpop.permute.xlu1 %928  ;;  %v927_v25 = vpop.permute.xlu0 %926 }
 0x372   : > { %v933_v16 = vmax.f32 %v2439_v3, %v929_v14  ;;  %v932_v36 = vmax.f32 %v2441_v29, %v927_v25 }
 0x374   : > { %936 = vst.msk [vmem:[#allocation2 + $0x8] sm:$0xff] %vm934_vm10, %v933_v16  ;;  %935 = vst.msk [vmem:[#allocation2] sm:$0xff] %vm934_vm10, %v932_v36 }
 0x375   : > { %v994_v23 = vpop.permute.xlu1 %993  ;;  %v992_v12 = vpop.permute.xlu0 %991 }
 0x376   : > { %v998_v22 = vmax.f32 %v2451_v6, %v994_v23  ;;  %v997_v37 = vmax.f32 %v2453_v52, %v992_v12 }
 0x377   : > { %v1003_v26 = vld [vmem:[#allocation2 + $0x10] ss:$2 sm:$0xff] }
 0x378   : > { %1000 = vst.msk [vmem:[#allocation2 + $0x28] sm:$0xff] %vm934_vm10, %v998_v22  ;;  %999 = vst.msk [vmem:[#allocation2 + $0x20] sm:$0xff] %vm934_vm10, %v997_v37  ;;  %1265 = vmatmul.mubr.msk.f32.vlgmr.msra.gmra.mrb[0].mxu1 %vm934_vm10, %v1003_v26 }
 0x379   : > { %1267 = vmatprep.mubr.msk.f32.mxu1 %vm1559_vm9, %v1560_v62 }
 0x37b   : > { %v1001_v53 = vld [vmem:[#allocation2] ss:$2 sm:$0xff] }
 0x37c   : > { %1262 = vmatmul.mubr.msk.f32.vlgmr.msra.gmra.mrb[0].mxu0 %vm934_vm10, %v1001_v53 }
 0x37f   : > { %v1005_v33 = vld [vmem:[#allocation2 + $0x20] ss:$2 sm:$0xff] }
 0x380   : > { %1268 = vmatmul.mubr.msk.f32.gmra.mrb[2].mxu1 %vm934_vm10, %v1005_v33 }
 0x44b   : > { %v1090_v1 = vpop.f32.mrb[0].mxu1 }
 0x44c   : > { %1101 = vst.msk [vmem:[%s175_s24 + $0x8] sm:$0xff] %vm1099_vm11, %v1090_v1  ;;  %v1266_v9 = vpop.f32.mrb[1].mxu1 }
 0x44f   : > { %v1085_v18 = vpop.f32.mrb[0].mxu0 }
 0x450   : > { %1100 = vst.msk [vmem:[%s175_s24] sm:$0xff] %vm1099_vm11, %v1085_v18  ;;  %v1263_v20 = vpop.f32.mrb[1].mxu0 }
 0x453   : > { %v1095_v45 = vpop.f32.mrb[2].mxu1 }
 0x454   : > { %1102 = vst.msk [vmem:[%s175_s24 + $0x10] sm:$0xff] %vm1099_vm11, %v1095_v45  ;;  %v1269_v17 = vpop.f32.mrb[3].mxu1 }
 0x455   : > { %1441 = shalt.err (!%p1438_p5)
}
 0x456   : > { %s1442_s23 = scalar_lea.hbm %s2533_s16, 384  ;;  %s1446_s24 = scalar_lea.hbm %s2598_s2, 1536 }
 0x457   : > { %p1443_p6 = scmp.ne.s32.totalorder %s2533_s16, %s1442_s23  ;;  %p1447_p2 = scmp.lt.u32.totalorder %s2533_s16, %s2598_s2 }
 0x458   : > { %p1448_p7 = scmp.lt.u32.totalorder %s1446_s24, %s1442_s23  ;;  %p1450_p0 = scmp.lt.u32.totalorder %s1442_s23, %s2533_s16 }
 0x459   : > { %p1444_p9 = pnand %p1443_p6, %p2676_p1 }
 0x45a   : > { %p1449_p4 = por %p1448_p7, %p1447_p2 }
 0x45b   : > { %p1445_p12 = pneg %p1444_p9 }
 0x45c   : > { %p1451_p3 = por %p1450_p0, %p1449_p4 }
 0x45e   : > { %p1452_p8 = pnand %p1451_p3, %p1445_p12 }
 0x460   : > { %1455 = shalt.err (!%p1452_p8)
}
 0x461   : > { %s1562_s20 = smov 128   ;;  %s1563_s27 = smov 256  }
 0x462   : > { %s1564_s15 = smov 8  }
 0x463   : > { %1287 = dma.vmem_to_hbm [thread:$0]  (%p2676_p1), %s2528_s7, 384, %s2533_s16, %s2535_s29, %s1562_s20, %s1563_s27, %s1564_s15  }
 0x464 PF: > { %p1298_p10 = scmp.ge.s32.totalorder %s1550_s19, 2  ;;  %s1133_s25 = sand.u32 1, %s1510_s9  }
 0x465   : > { %p2677_p11 = scmp.ne.s32.totalorder %s2607_s6, 0  ;;  %s1134_s12 = scalar_lea.sflag [#allocation5], %s1133_s25 }
 0x467   : > { %p1294_p13 = pnand %p1298_p10, %p2677_p11 }
 0x469   : > { %1505 = dma.done.wait (!%p1294_p13), %s1134_s12, 384  }
 0x46a   : > { %1507 = vsyncadd (!%p1294_p13), %s1134_s12, 4294966912  ;;  %s18_s19 = sadd.s32 1, %s1550_s19   ;;  %s2678_s3 = sld [smem:[#allocation9_spill]] }
 0x46b   : > { %p15_p5 = scmp.ge.s32.totalorder %s18_s19, 6   ;;  %s2679_s9 = smov %s1514_s10 }
 0x46c   : > { %s2680_s10 = smov %s1518_s11  ;;  %s2681_s11 = smov %s1670_s5 }
 0x46d   : > { %s2682_s12 = smov %s1526_s13  ;;  %s2683_s13 = smov %s1530_s14 }
 0x46e   : > { %s2684_s14 = smov %s1667_s4  ;;  %s2685_s15 = smov %s1542_s17 }
 0x46f   : > { %s2686_s16 = smov %s1546_s18  ;;  %s2687_s17 = smov %s2690_s22 }
 0x470   : > { %s2688_s18 = smov %s2678_s3  ;;  %17 = sbr.rel (!%p15_p5) target bundleno = 9 (0x9), region = 84 }
 0x477   :  { %1139 = vsyncpa [#allocation4], 1 }
 0x478   :  { %1141 = vsyncpa [#allocation4 + $0x1], 1 }
 0x479   :  { %1142 = vsyncpa [#allocation5], 1 }
 0x47a   :  { %1144 = vsyncpa [#allocation5 + $0x1], 1 }

</bundles_post_ra>
